<compile_context>
chip_gen: v7x
topology: tpu7x:2x2x1
jax: 0.10.0
libtpu: 0.0.40
codegen_flags: <defaults>
</compile_context>

<pallas_src>
import functools

import jax
import jax.numpy as jnp
from jax.experimental import pallas as pl
from jax.experimental.pallas import tpu as pltpu

_EPS = 1e-5


# ---------------------------------------------------------------------------
# Helpers
# ---------------------------------------------------------------------------
def _vmem_limit_bytes():
    """Chip-aware scoped VMEM limit (v7x has only 64 MiB per TensorCore)."""
    try:
        info = pltpu.get_tpu_info()
        cap = getattr(info, "vmem_capacity_bytes", None)
        if cap:
            return min(100 * 1024 * 1024, int(cap) * 3 // 4)
    except Exception:
        pass
    return 48 * 1024 * 1024


def _pack_upconv_weight(wt):
    """wt: PyTorch ConvTranspose2d weight (Cin, Cout, 4, 4) ->
    (2, 2, 4*Cin, Cout): for each output parity (py, px), the 2x2 contributing
    taps folded into the contraction dim in (dy, dx, ci) order -- the same
    channel order as the space-to-depth pre-pack of the input."""
    parities = []
    for py in range(2):
        row = []
        for px in range(2):
            taps = []
            for dy in range(2):
                for dx in range(2):
                    ky = 3 - 2 * dy - py
                    kx = 3 - 2 * dx - px
                    taps.append(wt[:, :, ky, kx])            # (Cin, Cout)
            row.append(jnp.concatenate(taps, axis=0))        # (4*Cin, Cout)
        parities.append(jnp.stack(row, axis=0))              # (2, 4*Cin, Cout)
    return jnp.stack(parities, axis=0)                       # (2, 2, 4*Cin, Cout)


# ---------------------------------------------------------------------------
# Pallas kernel
# ---------------------------------------------------------------------------
def _upconv_kernel(x_ref, w_ref, shift_ref, o_ref, *, h, wd, cin, cout):
    """x_ref:     (1, H+1, W+1, 4*Cin) bf16  space-to-depth packed padded input
       w_ref:     (2, 2, 4*Cin, Cout)  bf16  per-parity taps, BN scale folded in
       shift_ref: (1, 2*Cout)          f32   folded BN shift (+conv bias), px-tiled
       o_ref:     (1, H, 2, W, 2*Cout) bf16  y-parity = dim 2; x-parity lane-packed
    """
    shift = shift_ref[...]                                    # (1, 2*Cout) f32
    for py in range(2):
        cols = []
        for px in range(2):
            # One shifted window of the pre-packed input IS the im2col patch
            # for this parity: (H*W, 4*Cin); a single MXU matmul with K=4*Cin.
            patch = x_ref[0, py:py + h, px:px + wd, :].reshape(h * wd, 4 * cin)
            cols.append(jnp.dot(patch, w_ref[py, px],
                                preferred_element_type=jnp.float32))
        y = jnp.concatenate(cols, axis=-1)                    # (H*W, 2*Cout) f32
        y = y + shift                                         # BN shift + conv bias
        y = jnp.where(y > 0, y, 0.2 * y)                      # LeakyReLU(0.2)
        # Direct per-y-parity store (no stack across py): full 128-lane rows.
        o_ref[0, :, py] = y.reshape(h, wd, 2 * cout).astype(o_ref.dtype)


# ---------------------------------------------------------------------------
# Wrapper
# ---------------------------------------------------------------------------
def dcgan_upconv(x_nchw, w_packed, shift2):
    """Fused ConvTranspose2d(nin, nout, 4, 2, 1) + BatchNorm2d (inference) +
    LeakyReLU(0.2).

    Input : (N, Cin, H, W)   NCHW (PyTorch layout), any float dtype.
    Output: (N, 2H, 2W, Cout) bf16, NHWC.  Kept NHWC / bf16 on purpose: it
    removes the full-HBM output relayout and halves writeback traffic.
    Downstream layers should consume NHWC (see `nchw_view`)."""
    n, cin, h, wd = x_nchw.shape
    cout = w_packed.shape[-1]
    if cout % 64 or cin % 32:
        raise ValueError("dcgan_upconv kernel assumes Cout % 64 == 0 and "
                         "Cin % 32 == 0 (lane-dense packing).")

    # NCHW -> NHWC, bf16, 1-pixel halo pad, then space-to-depth pre-pack:
    # x2[n, a, b, (dy, dx, ci)] = xp[n, a+dy, b+dx, ci] -> (N, H+1, W+1, 4*Cin).
    x = jnp.transpose(x_nchw, (0, 2, 3, 1)).astype(jnp.bfloat16)
    xp = jnp.pad(x, ((0, 0), (1, 1), (1, 1), (0, 0)))
    x2 = jnp.concatenate(
        [xp[:, dy:dy + h + 1, dx:dx + wd + 1, :]
         for dy in range(2) for dx in range(2)], axis=-1)

    kern = functools.partial(_upconv_kernel, h=h, wd=wd, cin=cin, cout=cout)
    out5 = pl.pallas_call(
        kern,
        out_shape=jax.ShapeDtypeStruct((n, h, 2, wd, 2 * cout), jnp.bfloat16),
        grid=(n,),
        in_specs=[
            pl.BlockSpec((1, h + 1, wd + 1, 4 * cin), lambda b: (b, 0, 0, 0)),
            pl.BlockSpec((2, 2, 4 * cin, cout), lambda b: (0, 0, 0, 0)),
            pl.BlockSpec((1, 2 * cout), lambda b: (0, 0)),
        ],
        out_specs=pl.BlockSpec((1, h, 2, wd, 2 * cout),
                               lambda b: (b, 0, 0, 0, 0)),
        compiler_params=pltpu.CompilerParams(
            dimension_semantics=("parallel",),
            vmem_limit_bytes=_vmem_limit_bytes(),
        ),
    )(x2, w_packed, shift2)

    # (N, H, 2, W, 2*Cout) row-major == (N, 2H, 2W, Cout) row-major: free reshape.
    return out5.reshape(n, 2 * h, 2 * wd, cout)


def nchw_view(y_nhwc):
    """Optional drop-in-compat view (reintroduces a full-HBM relayout; avoid on
    the hot path -- keep the pipeline NHWC instead)."""
    return jnp.transpose(y_nhwc, (0, 3, 1, 2)).astype(jnp.float32)


# ---------------------------------------------------------------------------
# Parameters (deterministic, synthetic -- matching the module's __init__ shapes)
# ---------------------------------------------------------------------------
def init_params(key, nin, nout):
    kw, kb, kg, kbt, km, kv = jax.random.split(key, 6)
    wt = jax.random.normal(kw, (nin, nout, 4, 4), jnp.float32) / jnp.sqrt(16.0 * nin)
    bias = 0.01 * jax.random.normal(kb, (nout,), jnp.float32)
    # Non-trivial BatchNorm affine params / running stats so the fold is tested.
    gamma = 1.0 + 0.2 * jax.random.normal(kg, (nout,), jnp.float32)
    beta = 0.1 * jax.random.normal(kbt, (nout,), jnp.float32)
    mean = 0.1 * jax.random.normal(km, (nout,), jnp.float32)
    var = 1.0 + 0.3 * jax.random.uniform(kv, (nout,), jnp.float32)
    scale = gamma / jnp.sqrt(var + _EPS)                      # fold BN (inference)
    shift = beta + scale * (bias - mean)                      # conv bias folded in
    # BN scale folded into the packed bf16 weights -> epilogue is add + LeakyReLU.
    w_packed = (_pack_upconv_weight(wt) * scale[None, None, None, :]
                ).astype(jnp.bfloat16)                        # (2, 2, 4*Cin, Cout)
    shift2 = jnp.tile(shift, 2)[None, :].astype(jnp.float32)  # (1, 2*Cout), px-tiled
    return {"w_packed": w_packed, "shift2": shift2, "wt": wt, "bias": bias,
            "gamma": gamma, "beta": beta, "mean": mean, "var": var}


# ---------------------------------------------------------------------------
# Pure-JAX reference (ConvTranspose2d(4,2,1) + inference BN + LeakyReLU(0.2))
# ---------------------------------------------------------------------------
def _reference(x_nchw, wt, bias, gamma, beta, mean, var):
    # Operands rounded to bf16 to match the kernel's MXU inputs (accum is f32).
    x = x_nchw.astype(jnp.bfloat16).astype(jnp.float32)
    w = wt.astype(jnp.bfloat16).astype(jnp.float32)
    w_oihw = jnp.transpose(jnp.flip(w, axis=(2, 3)), (1, 0, 2, 3))  # (Cout,Cin,4,4)
    y = jax.lax.conv_general_dilated(
        x, w_oihw, window_strides=(1, 1), padding=((2, 2), (2, 2)),
        lhs_dilation=(2, 2), dimension_numbers=("NCHW", "OIHW", "NCHW"),
        precision=jax.lax.Precision.HIGHEST)
    y = y + bias[None, :, None, None]
    scale = (gamma / jnp.sqrt(var + _EPS))[None, :, None, None]
    y = (y - mean[None, :, None, None]) * scale + beta[None, :, None, None]
    y = jnp.where(y > 0, y, 0.2 * y)
    return jnp.transpose(y, (0, 2, 3, 1))                     # NHWC for comparison


# ---------------------------------------------------------------------------
if __name__ == "__main__":
    N, NIN, NOUT, H, W = 2, 64, 64, 16, 16
    key = jax.random.PRNGKey(0)
    kx, kp = jax.random.split(key)
    x = jax.random.normal(kx, (N, NIN, H, W), jnp.float32)    # NCHW like PyTorch
    p = init_params(kp, NIN, NOUT)

    fwd = jax.jit(dcgan_upconv)
    out = jax.block_until_ready(fwd(x, p["w_packed"], p["shift2"]))

    assert out.shape == (N, 2 * H, 2 * W, NOUT), out.shape
    assert out.dtype == jnp.bfloat16

    ref = _reference(x, p["wt"], p["bias"], p["gamma"], p["beta"],
                     p["mean"], p["var"])
    out_f32 = out.astype(jnp.float32)
    err = float(jnp.max(jnp.abs(out_f32 - ref)))
    assert bool(jnp.all(jnp.isfinite(out_f32))) and err < 3e-2, err

    print("KERNEL_OK")
</pallas_src>

<mosaic_0001>
module attributes {stable_mosaic.version = 11 : i64} {
  func.func @_upconv_kernel(%arg0: i32, %arg1: memref<1x17x17x256xbf16, #tpu.memory_space<vmem>>, %arg2: memref<2x2x256x64xbf16, #tpu.memory_space<vmem>>, %arg3: memref<1x128xf32, #tpu.memory_space<vmem>>, %arg4: memref<1x16x2x16x128xbf16, #tpu.memory_space<vmem>>) attributes {dimension_semantics = [#tpu.dimension_semantics<parallel>], iteration_bounds = array<i64: 2>, scalar_prefetch = 0 : i64, scratch_operands = 0 : i64, tpu.core_type = #tpu.core_type<tc>, window_params = [{transform_indices = @transform_0, window_bounds = array<i64: 1, 17, 17, 256>}, {pipeline_mode = #tpu.pipeline_mode<synchronous>, transform_indices = @transform_1, window_bounds = array<i64: 2, 2, 256, 64>}, {pipeline_mode = #tpu.pipeline_mode<synchronous>, transform_indices = @transform_2, window_bounds = array<i64: 1, 128>}, {transform_indices = @transform_3, window_bounds = array<i64: 1, 16, 2, 16, 128>}]} {
    %c0 = arith.constant 0 : index
    %c0_0 = arith.constant 0 : index
    %0 = vector.load %arg3[%c0, %c0_0] : memref<1x128xf32, #tpu.memory_space<vmem>>, vector<1x128xf32>
    %c0_1 = arith.constant 0 : index
    %c0_2 = arith.constant 0 : index
    %c0_3 = arith.constant 0 : index
    %c0_4 = arith.constant 0 : index
    %1 = vector.load %arg1[%c0_1, %c0_2, %c0_3, %c0_4] : memref<1x17x17x256xbf16, #tpu.memory_space<vmem>>, vector<1x16x16x256xbf16>
    %2 = vector.shape_cast %1 : vector<1x16x16x256xbf16> to vector<16x16x256xbf16>
    %3 = vector.shape_cast %2 : vector<16x16x256xbf16> to vector<256x256xbf16>
    %c0_5 = arith.constant 0 : index
    %c0_6 = arith.constant 0 : index
    %c0_7 = arith.constant 0 : index
    %c0_8 = arith.constant 0 : index
    %4 = vector.load %arg2[%c0_5, %c0_6, %c0_7, %c0_8] : memref<2x2x256x64xbf16, #tpu.memory_space<vmem>>, vector<1x1x256x64xbf16>
    %5 = vector.shape_cast %4 : vector<1x1x256x64xbf16> to vector<256x64xbf16>
    %cst = arith.constant dense<0.000000e+00> : vector<256x64xf32>
    %6 = tpu.matmul %3, %5, %cst {dimension_numbers = #tpu.dot_dimension_numbers<[1], [0], [0], [1], [0, 0, 1, 1], [], []>} : vector<256x256xbf16>, vector<256x64xbf16>, vector<256x64xf32> -> vector<256x64xf32>
    %c0_9 = arith.constant 0 : index
    %c0_10 = arith.constant 0 : index
    %c1 = arith.constant 1 : index
    %c0_11 = arith.constant 0 : index
    %7 = vector.load %arg1[%c0_9, %c0_10, %c1, %c0_11] : memref<1x17x17x256xbf16, #tpu.memory_space<vmem>>, vector<1x16x16x256xbf16>
    %8 = vector.shape_cast %7 : vector<1x16x16x256xbf16> to vector<16x16x256xbf16>
    %9 = vector.shape_cast %8 : vector<16x16x256xbf16> to vector<256x256xbf16>
    %c0_12 = arith.constant 0 : index
    %c1_13 = arith.constant 1 : index
    %c0_14 = arith.constant 0 : index
    %c0_15 = arith.constant 0 : index
    %10 = vector.load %arg2[%c0_12, %c1_13, %c0_14, %c0_15] : memref<2x2x256x64xbf16, #tpu.memory_space<vmem>>, vector<1x1x256x64xbf16>
    %11 = vector.shape_cast %10 : vector<1x1x256x64xbf16> to vector<256x64xbf16>
    %cst_16 = arith.constant dense<0.000000e+00> : vector<256x64xf32>
    %12 = tpu.matmul %9, %11, %cst_16 {dimension_numbers = #tpu.dot_dimension_numbers<[1], [0], [0], [1], [0, 0, 1, 1], [], []>} : vector<256x256xbf16>, vector<256x64xbf16>, vector<256x64xf32> -> vector<256x64xf32>
    %13 = tpu.concatenate %6, %12 in 1 : vector<256x64xf32>, vector<256x64xf32> -> vector<256x128xf32>
    %14 = vector.broadcast %0 : vector<1x128xf32> to vector<256x128xf32>
    %15 = arith.addf %13, %14 : vector<256x128xf32>
    %cst_17 = arith.constant 0.000000e+00 : f32
    %16 = vector.broadcast %cst_17 : f32 to vector<256x128xf32>
    %17 = arith.cmpf ogt, %15, %16 : vector<256x128xf32>
    %cst_18 = arith.constant 2.000000e-01 : f32
    %18 = vector.broadcast %cst_18 : f32 to vector<256x128xf32>
    %19 = arith.mulf %18, %15 : vector<256x128xf32>
    %20 = arith.select %17, %15, %19 : vector<256x128xi1>, vector<256x128xf32>
    %21 = vector.shape_cast %20 : vector<256x128xf32> to vector<16x16x128xf32>
    %22 = arith.truncf %21 : vector<16x16x128xf32> to vector<16x16x128xbf16>
    %c0_19 = arith.constant 0 : index
    %c0_20 = arith.constant 0 : index
    %c0_21 = arith.constant 0 : index
    %c0_22 = arith.constant 0 : index
    %c0_23 = arith.constant 0 : index
    %23 = vector.load %arg4[%c0_19, %c0_20, %c0_21, %c0_22, %c0_23] : memref<1x16x2x16x128xbf16, #tpu.memory_space<vmem>>, vector<1x16x1x16x128xbf16>
    %24 = vector.shape_cast %23 : vector<1x16x1x16x128xbf16> to vector<16x16x128xbf16>
    %25 = vector.shape_cast %22 : vector<16x16x128xbf16> to vector<1x16x1x16x128xbf16>
    tpu.vector_store %arg4[%c0_19, %c0_20, %c0_21, %c0_22, %c0_23], %25 {strides = array<i32>} : memref<1x16x2x16x128xbf16, #tpu.memory_space<vmem>>, vector<1x16x1x16x128xbf16>,
    %c0_24 = arith.constant 0 : index
    %c1_25 = arith.constant 1 : index
    %c0_26 = arith.constant 0 : index
    %c0_27 = arith.constant 0 : index
    %26 = vector.load %arg1[%c0_24, %c1_25, %c0_26, %c0_27] : memref<1x17x17x256xbf16, #tpu.memory_space<vmem>>, vector<1x16x16x256xbf16>
    %27 = vector.shape_cast %26 : vector<1x16x16x256xbf16> to vector<16x16x256xbf16>
    %28 = vector.shape_cast %27 : vector<16x16x256xbf16> to vector<256x256xbf16>
    %c1_28 = arith.constant 1 : index
    %c0_29 = arith.constant 0 : index
    %c0_30 = arith.constant 0 : index
    %c0_31 = arith.constant 0 : index
    %29 = vector.load %arg2[%c1_28, %c0_29, %c0_30, %c0_31] : memref<2x2x256x64xbf16, #tpu.memory_space<vmem>>, vector<1x1x256x64xbf16>
    %30 = vector.shape_cast %29 : vector<1x1x256x64xbf16> to vector<256x64xbf16>
    %cst_32 = arith.constant dense<0.000000e+00> : vector<256x64xf32>
    %31 = tpu.matmul %28, %30, %cst_32 {dimension_numbers = #tpu.dot_dimension_numbers<[1], [0], [0], [1], [0, 0, 1, 1], [], []>} : vector<256x256xbf16>, vector<256x64xbf16>, vector<256x64xf32> -> vector<256x64xf32>
    %c0_33 = arith.constant 0 : index
    %c1_34 = arith.constant 1 : index
    %c1_35 = arith.constant 1 : index
    %c0_36 = arith.constant 0 : index
    %32 = vector.load %arg1[%c0_33, %c1_34, %c1_35, %c0_36] : memref<1x17x17x256xbf16, #tpu.memory_space<vmem>>, vector<1x16x16x256xbf16>
    %33 = vector.shape_cast %32 : vector<1x16x16x256xbf16> to vector<16x16x256xbf16>
    %34 = vector.shape_cast %33 : vector<16x16x256xbf16> to vector<256x256xbf16>
    %c1_37 = arith.constant 1 : index
    %c1_38 = arith.constant 1 : index
    %c0_39 = arith.constant 0 : index
    %c0_40 = arith.constant 0 : index
    %35 = vector.load %arg2[%c1_37, %c1_38, %c0_39, %c0_40] : memref<2x2x256x64xbf16, #tpu.memory_space<vmem>>, vector<1x1x256x64xbf16>
    %36 = vector.shape_cast %35 : vector<1x1x256x64xbf16> to vector<256x64xbf16>
    %cst_41 = arith.constant dense<0.000000e+00> : vector<256x64xf32>
    %37 = tpu.matmul %34, %36, %cst_41 {dimension_numbers = #tpu.dot_dimension_numbers<[1], [0], [0], [1], [0, 0, 1, 1], [], []>} : vector<256x256xbf16>, vector<256x64xbf16>, vector<256x64xf32> -> vector<256x64xf32>
    %38 = tpu.concatenate %31, %37 in 1 : vector<256x64xf32>, vector<256x64xf32> -> vector<256x128xf32>
    %39 = vector.broadcast %0 : vector<1x128xf32> to vector<256x128xf32>
    %40 = arith.addf %38, %39 : vector<256x128xf32>
    %cst_42 = arith.constant 0.000000e+00 : f32
    %41 = vector.broadcast %cst_42 : f32 to vector<256x128xf32>
    %42 = arith.cmpf ogt, %40, %41 : vector<256x128xf32>
    %cst_43 = arith.constant 2.000000e-01 : f32
    %43 = vector.broadcast %cst_43 : f32 to vector<256x128xf32>
    %44 = arith.mulf %43, %40 : vector<256x128xf32>
    %45 = arith.select %42, %40, %44 : vector<256x128xi1>, vector<256x128xf32>
    %46 = vector.shape_cast %45 : vector<256x128xf32> to vector<16x16x128xf32>
    %47 = arith.truncf %46 : vector<16x16x128xf32> to vector<16x16x128xbf16>
    %c0_44 = arith.constant 0 : index
    %c0_45 = arith.constant 0 : index
    %c1_46 = arith.constant 1 : index
    %c0_47 = arith.constant 0 : index
    %c0_48 = arith.constant 0 : index
    %48 = vector.load %arg4[%c0_44, %c0_45, %c1_46, %c0_47, %c0_48] : memref<1x16x2x16x128xbf16, #tpu.memory_space<vmem>>, vector<1x16x1x16x128xbf16>
    %49 = vector.shape_cast %48 : vector<1x16x1x16x128xbf16> to vector<16x16x128xbf16>
    %50 = vector.shape_cast %47 : vector<16x16x128xbf16> to vector<1x16x1x16x128xbf16>
    tpu.vector_store %arg4[%c0_44, %c0_45, %c1_46, %c0_47, %c0_48], %50 {strides = array<i32>} : memref<1x16x2x16x128xbf16, #tpu.memory_space<vmem>>, vector<1x16x1x16x128xbf16>,
    return
  }
  func.func @transform_0(%arg0: i32) -> (i32, i32, i32, i32) {
    %c0_i32 = arith.constant 0 : i32
    %c0_i32_0 = arith.constant 0 : i32
    %c0_i32_1 = arith.constant 0 : i32
    %c0_i32_2 = arith.constant 0 : i32
    return %arg0, %c0_i32, %c0_i32_0, %c0_i32_1 : i32, i32, i32, i32
  }
  func.func @transform_1(%arg0: i32) -> (i32, i32, i32, i32) {
    %c0_i32 = arith.constant 0 : i32
    %c0_i32_0 = arith.constant 0 : i32
    %c0_i32_1 = arith.constant 0 : i32
    %c0_i32_2 = arith.constant 0 : i32
    %c0_i32_3 = arith.constant 0 : i32
    return %c0_i32, %c0_i32_0, %c0_i32_1, %c0_i32_2 : i32, i32, i32, i32
  }
  func.func @transform_2(%arg0: i32) -> (i32, i32) {
    %c0_i32 = arith.constant 0 : i32
    %c0_i32_0 = arith.constant 0 : i32
    %c0_i32_1 = arith.constant 0 : i32
    return %c0_i32, %c0_i32_0 : i32, i32
  }
  func.func @transform_3(%arg0: i32) -> (i32, i32, i32, i32, i32) {
    %c0_i32 = arith.constant 0 : i32
    %c0_i32_0 = arith.constant 0 : i32
    %c0_i32_1 = arith.constant 0 : i32
    %c0_i32_2 = arith.constant 0 : i32
    %c0_i32_3 = arith.constant 0 : i32
    return %arg0, %c0_i32, %c0_i32_0, %c0_i32_1, %c0_i32_2 : i32, i32, i32, i32, i32
  }
}

</mosaic_0001>

<bundles_post_ra>
// kernel: dcgan_upconv.1
= control target key start
LH: loop header
LB: loop body
LE: loop exit
PB: predicated region body
PF: predicated region fallthrough
CT: control target
= control target key end

     0   :  { %s5141_s12 = smov 0   ;;  %s6513_s0 = inlined_call_operand.vmem [shape: bf16[2,17,17,256], index: 0, kind: input, shape index: {}]   ;;  %s6514_s1 = inlined_call_operand.vmem [shape: bf16[2,2,256,64], index: 1, kind: input, shape index: {}]   ;;  %s6515_s2 = inlined_call_operand.vmem [shape: f32[1,128], index: 2, kind: input, shape index: {}]   ;;  %s6516_s3 = inlined_call_operand.vmem [shape: bf16[2,16,2,16,128], index: 3, kind: output, shape index: {}]  }
   0x1 LB: > { %s3799_s13 = sadd.s32 4294967295, %s5118_s12   ;;  %p3803_p0 = scmp.ge.s32.totalorder %s5118_s12, 1  ;;  %s5118_s12 = sphi %s5141_s12, %s13_s12  }
   0x2   : > { %p137_p1 = scmp.lt.s32.totalorder %s5118_s12, 3 }
   0x4   : > { %p138_p2 = pnand %p3803_p0, %p137_p1 }
   0x5   : > { %v4988_v0 = vld [vmem:[%s6514_s1 + $0xc0] sm:$0xff] (!%p138_p2)   ;;  %p161_p3 = scmp.lt.s32.totalorder (!%p138_p2), %s3799_s13, 1  ;;  %v4990_v2 = vld [vmem:[%s6514_s1 + $0xc8] sm:$0xff] (!%p138_p2)   ;;  %v4992_v4 = vld [vmem:[%s6514_s1 + $0xd0] sm:$0xff] (!%p138_p2)   ;;  %vm702_vm0 = vsmask.f32 (!%p138_p2), 3328 }
   0x6   : > { %141 = sbr.rel (%p138_p2) target bundleno = 627 (0x273), region = 32  ;;  %v4989_v1 = vld [vmem:[%s6514_s1 + $0x80] sm:$0xff] (!%p138_p2)   ;;  %4642 = vmatprep.subr.bf16.mxu1 (!%p138_p2), %v4988_v0  ;;  %v4991_v3 = vld [vmem:[%s6514_s1 + $0x88] sm:$0xff] (!%p138_p2)   ;;  %v4993_v5 = vld [vmem:[%s6514_s1 + $0x90] sm:$0xff] (!%p138_p2)   ;;  %vm703_vm1 = vsmask.f32 (!%p138_p2), 7440 }
   0x7   : > { %4643 = vmatpush3.bf16.msra.mxu1 (!%p138_p2), %v4989_v1  ;;  %v4994_v6 = vld [vmem:[%s6514_s1 + $0xd8] sm:$0xff] (!%p138_p2)   ;;  %v4996_v8 = vld [vmem:[%s6514_s1 + $0xe0] sm:$0xff] (!%p138_p2)   ;;  %v4998_v10 = vld [vmem:[%s6514_s1 + $0xe8] sm:$0xff] (!%p138_p2)   ;;  %s5120_s25 = smov (!%p138_p2), 64   ;;  %vm1635_vm3 = vcmask (!%p138_p2), 523264  }
   0x8   : > { %4644 = vmatprep.subr.bf16.mxu1 (!%p138_p2), %v4990_v2  ;;  %v4995_v7 = vld [vmem:[%s6514_s1 + $0x98] sm:$0xff] (!%p138_p2)   ;;  %v4997_v9 = vld [vmem:[%s6514_s1 + $0xa0] sm:$0xff] (!%p138_p2)   ;;  %v4999_v14 = vld [vmem:[%s6514_s1 + $0xa8] sm:$0xff] (!%p138_p2)  }
   0x9   : > { %v5000_v22 = vld [vmem:[%s6514_s1 + $0xf0] sm:$0xff] (!%p138_p2)   ;;  %vm5229_vm2 = vmor (!%p138_p2), %vm702_vm0, %vm703_vm1  ;;  %v5002_v48 = vld [vmem:[%s6514_s1 + $0xf8] sm:$0xff] (!%p138_p2)  }
   0xa   : > { %v5001_v30 = vld [vmem:[%s6514_s1 + $0xb0] sm:$0xff] (!%p138_p2)   ;;  %v5003_v61 = vld [vmem:[%s6514_s1 + $0xb8] sm:$0xff] (!%p138_p2)  }
   0xb   : > { %4645 = vmatpush3.bf16.msra.mxu1 (!%p138_p2), %v4991_v3 }
   0xc   : > { %4646 = vmatprep.subr.bf16.mxu1 (!%p138_p2), %v4992_v4  ;;  %v5004_v4 = vld [vmem:[%s6514_s1 + $0x1c0] sm:$0xff] (!%p138_p2)  }
   0xd   : > { %s6520_s13 = smov (!%p161_p3, %s3799_s13), 1 }
   0xe   : > { %s4978_s28 = smul.u32 408, %s6520_s13  ;;  %s4274_s27 = sshll.u32 %s6520_s13, 8 }
   0xf   : > { %4647 = vmatpush3.bf16.msra.mxu1 %v4993_v5  ;;  %s6167_s30 = scalar_lea.vmem %s6516_s3, %s4274_s27 }
  0x10   : > { %4648 = vmatprep.subr.bf16.mxu1 %v4994_v6  ;;  %s5182_s8 = scalar_lea.vmem %s6513_s0, %s4978_s28 }
  0x11   : > { %v5191_v11 = vld [vmem:[%s5182_s8] sm:$0xff]  ;;  %v5194_v12 = vld [vmem:[%s5182_s8 + $0x8] sm:$0xff]  ;;  %v656_v13 = vld [vmem:[%s5182_s8 + $0x10] sm:$0x11] }
  0x12   : > { %v706_v15 = vshrl.u32 %v5191_v11, 16  ;;  %v709_v16 = vshll.u32 %v5191_v11, 16  ;;  %v715_v17 = vshll.u32 %v5194_v12, 16  ;;  %v719_v18 = vshrl.u32 %v5194_v12, 16  ;;  %v5212_v28 = vld [vmem:[%s5182_s8 + $0x18] sm:$0xff]  ;;  %v5215_v29 = vld [vmem:[%s5182_s8 + $0x20] sm:$0xff] }
  0x13   : > { %4649 = vmatpush3.bf16.msra.mxu1 %v4995_v7  ;;  %v725_v19 = vshll.u32 %v656_v13, 16  ;;  %v3807_v20 = vcombine.low %v5191_v11, %v5194_v12  ;;  %v3808_v21 = vcombine.high %v5191_v11, %v5194_v12  ;;  %v659_v32 = vld [vmem:[%s5182_s8 + $0x28] sm:$0x11]  ;;  %v730_v33 = vshrl.u32 %v5212_v28, 16  ;;  %v5225_v36 = vld [vmem:[%s5182_s8 + $0x30] sm:$0xff]  ;;  %v5235_v41 = vld [vmem:[%s5182_s8 + $0x38] sm:$0xff] }
  0x14   : > { %4650 = vmatprep.subr.bf16.mxu1 %v4996_v8  ;;  %v708_v23 = vrot.slane %v706_v15, 4  ;;  %v711_v24 = vrot.slane %v709_v16, 5  ;;  %v717_v25 = vrot.slane %v715_v17, 5  ;;  %v721_v26 = vrot.slane %v719_v18, 4  ;;  %v662_v42 = vld [vmem:[%s5182_s8 + $0x40] sm:$0x11] }
  0x15   : > { %v727_v27 = vrot.slane %v725_v19, 5  ;;  %525 = vmatprep.mubr.bf16.mxu0 %v3808_v21  ;;  %v733_v34 = vshll.u32 %v5212_v28, 16  ;;  %v739_v35 = vshll.u32 %v5215_v29, 16  ;;  %v743_v39 = vshrl.u32 %v5215_v29, 16  ;;  %v5250_v60 = vld [vmem:[%s5182_s8 + $0x48] sm:$0xff]  ;;  %v5256_v2 = vld [vmem:[%s5182_s8 + $0x50] sm:$0xff] }
  0x16   : > { %v712_v31 = vor.u32 %v711_v24, %v708_v23  ;;  %v722_v38 = vor.u32 %v721_v26, %v717_v25  ;;  %v749_v40 = vshll.u32 %v659_v32, 16  ;;  %v754_v43 = vshrl.u32 %v5225_v36, 16  ;;  %v5006_v23 = vld [vmem:[%s6514_s1 + $0x1c8] sm:$0xff]   ;;  %v665_v26 = vld [vmem:[%s5182_s8 + $0x58] sm:$0x11]  ;;  %v5285_v32 = vld [vmem:[%s5182_s8 + $0x60] sm:$0xff] }
  0x17   : > { %4651 = vmatpush3.bf16.msra.mxu1 %v4997_v9  ;;  %v732_v45 = vrot.slane %v730_v33, 4  ;;  %v735_v46 = vrot.slane %v733_v34, 5  ;;  %v741_v47 = vrot.slane %v739_v35, 5  ;;  %v745_v50 = vrot.slane %v743_v39, 4  ;;  %v5288_v33 = vld [vmem:[%s5182_s8 + $0x68] sm:$0xff] }
  0x18   : > { %4652 = vmatprep.subr.bf16.mxu1 %v4998_v10  ;;  %v713_v44 = vrot.slane %v712_v31, 4  ;;  %v723_v49 = vrot.slane %v722_v38, 4  ;;  %v756_v51 = vrot.slane %v754_v43, 4  ;;  %v757_v54 = vshll.u32 %v5225_v36, 16  ;;  %v5007_v35 = vld [vmem:[%s6514_s1 + $0x188] sm:$0xff]  }
  0x19   : > { %v736_v53 = vor.u32 %v735_v46, %v732_v45  ;;  %v763_v55 = vshll.u32 %v5235_v41, 16  ;;  %v746_v57 = vor.u32 %v745_v50, %v741_v47  ;;  %v751_v58 = vrot.slane %v749_v40, 5  ;;  %v5008_v46 = vld [vmem:[%s6514_s1 + $0x1d0] sm:$0xff]   ;;  %v4082_v11 = vld [vmem:[%s5182_s8 + $0x28] sm:$0x11] }
  0x1a   : > { %v718_v52 = vsel %vm5229_vm2, %v713_v44, %v717_v25  ;;  %v728_v56 = vsel %vm5229_vm2, %v723_v49, %v727_v27  ;;  %v767_v59 = vshrl.u32 %v5235_v41, 16  ;;  %v759_v0 = vrot.slane %v757_v54, 5  ;;  %v668_v49 = vld [vmem:[%s5182_s8 + $0x70] sm:$0x11]  ;;  %v5044_v12 = vld [vmem:[%s6514_s1 + $0x148] sm:$0xff]  }
  0x1b   : > { %4653 = vmatpush3.bf16.msra.mxu1 %v4999_v14  ;;  %v3888_v62 = vcombine.high %v718_v52, %v728_v56  ;;  %v737_v63 = vrot.slane %v736_v53, 4  ;;  %v773_v1 = vshll.u32 %v662_v42, 16  ;;  %v3887_v3 = vcombine.low %v718_v52, %v728_v56  ;;  %v5005_v14 = vld [vmem:[%s6514_s1 + $0x180] sm:$0xff]   ;;  %v5009_v50 = vld [vmem:[%s6514_s1 + $0x190] sm:$0xff]   ;;  %v5010_v56 = vld [vmem:[%s6514_s1 + $0x1d8] sm:$0xff]  }
  0x1c   : > { %4654 = vmatprep.subr.bf16.mxu1 %v5000_v22  ;;  %v5261_v5 = vrot.slane %v746_v57, 4  ;;  %v765_v6 = vrot.slane %v763_v55, 5  ;;  %v769_v7 = vrot.slane %v767_v59, 4  ;;  %v760_v9 = vor.u32 %v759_v0, %v756_v51  ;;  %v5313_v51 = vld [vmem:[%s5182_s8 + $0x78] sm:$0xff] }
  0x1d   : > { %1378 = vmatprep.mubr.bf16.mxu1 %v3888_v62  ;;  %v5265_v8 = vsel %vm5229_vm2, %v737_v63, %v741_v47  ;;  %v778_v10 = vshrl.u32 %v5250_v60, 16  ;;  %v781_v13 = vshll.u32 %v5250_v60, 16  ;;  %v787_v17 = vshll.u32 %v5256_v2, 16  ;;  %v5322_v62 = vld [vmem:[%s5182_s8 + $0x80] sm:$0xff] }
  0x1e   : > { %v752_v15 = vsel %vm5229_vm2, %v5261_v5, %v751_v58  ;;  %v770_v16 = vor.u32 %v769_v7, %v765_v6  ;;  %v791_v18 = vshrl.u32 %v5256_v2, 16  ;;  %v761_v21 = vrot.slane %v760_v9, 4 }
  0x1f   : > { %4655 = vmatpush3.bf16.msra.mxu1 %v5001_v30  ;;  %v3890_v19 = vcombine.high %v5265_v8, %v752_v15  ;;  %v775_v22 = vrot.slane %v773_v1, 5  ;;  %v780_v24 = vrot.slane %v778_v10, 4  ;;  %v783_v27 = vrot.slane %v781_v13, 5 }
  0x20   : > { %4656 = vmatprep.subr.bf16.mxu1 %v5002_v48  ;;  %v5281_v25 = vrot.slane %v770_v16, 4  ;;  %v789_v30 = vrot.slane %v787_v17, 5  ;;  %v793_v31 = vrot.slane %v791_v18, 4  ;;  %v5292_v34 = vsel %vm5229_vm2, %v761_v21, %v765_v6  ;;  %v5011_v6 = vld [vmem:[%s6514_s1 + $0x198] sm:$0xff]   ;;  %v5345_v16 = vld [vmem:[%s5182_s8 + $0x90] sm:$0xff] }
  0x21   : > { %v784_v38 = vor.u32 %v783_v27, %v780_v24  ;;  %v797_v40 = vshll.u32 %v665_v26, 16  ;;  %v802_v43 = vshrl.u32 %v5285_v32, 16  ;;  %v805_v44 = vshll.u32 %v5285_v32, 16  ;;  %v5349_v18 = vld [vmem:[%s5182_s8 + $0x98] sm:$0xff]  ;;  %v5013_v24 = vld [vmem:[%s6514_s1 + $0x1a0] sm:$0xff]  }
  0x22   : > { %v794_v39 = vor.u32 %v793_v31, %v789_v30  ;;  %v776_v42 = vsel %vm5229_vm2, %v5281_v25, %v775_v22  ;;  %v811_v45 = vshll.u32 %v5288_v33, 16  ;;  %v815_v47 = vshrl.u32 %v5288_v33, 16 }
  0x23   : > { %4657 = vmatpush3.bf16.msra.mxu1 %v5003_v61  ;;  %v3889_v48 = vcombine.low %v5265_v8, %v752_v15  ;;  %v3892_v52 = vcombine.high %v5292_v34, %v776_v42  ;;  %v785_v53 = vrot.slane %v784_v38, 4  ;;  %v799_v55 = vrot.slane %v797_v40, 5  ;;  %v671_v15 = vld [vmem:[%s5182_s8 + $0x88] sm:$0x11]  ;;  %v5015_v38 = vld [vmem:[%s6514_s1 + $0x40] sm:$0xff]  }
  0x24   : > { %4866 = vmatprep.subr.bf16.mxu1 %v5004_v4  ;;  %v5316_v54 = vrot.slane %v794_v39, 4  ;;  %v804_v57 = vrot.slane %v802_v43, 4  ;;  %v807_v58 = vrot.slane %v805_v44, 5  ;;  %v813_v59 = vrot.slane %v811_v45, 5  ;;  %4530 = vmatprep.subr.bf16.mxu0 %v5015_v38  ;;  %v679_v38 = vld [vmem:[%s5182_s8 + $0xc8] sm:$0xff] }
  0x25   : > { %v817_v61 = vrot.slane %v815_v47, 4  ;;  %v821_v63 = vshll.u32 %v668_v49, 16  ;;  %v5326_v0 = vsel %vm5229_vm2, %v785_v53, %v789_v30  ;;  %v829_v4 = vshll.u32 %v5313_v51, 16 }
  0x26   : > { %1379 = vmatmul.mubr.bf16.vlgmr.msra.gmra.mrb[0].mxu1 %v3887_v3  ;;  %v5331_v1 = vsel %vm5229_vm2, %v5316_v54, %v799_v55  ;;  %v826_v3 = vshrl.u32 %v5313_v51, 16  ;;  %v808_v7 = vor.u32 %v807_v58, %v804_v57  ;;  %v835_v10 = vshll.u32 %v5322_v62, 16  ;;  %v5019_v58 = vld [vmem:[%s6514_s1 + $0x8] sm:$0xff]  }
  0x27   : > { %4867 = vmatpush3.bf16.msra.mxu1 %v5005_v14  ;;  %1386 = vmatprep.mubr.bf16.mxu1 %v3890_v19  ;;  %v818_v9 = vor.u32 %v817_v61, %v813_v59  ;;  %v839_v13 = vshrl.u32 %v5322_v62, 16  ;;  %v5012_v14 = vld [vmem:[%s6514_s1 + $0x1e0] sm:$0xff]   ;;  %v3891_v17 = vcombine.low %v5292_v34, %v776_v42  ;;  %v3894_v19 = vcombine.high %v5326_v0, %v5331_v1 }
  0x28   : > { %4868 = vmatprep.subr.bf16.mxu1 %v5006_v23  ;;  %v823_v21 = vrot.slane %v821_v63, 5  ;;  %v828_v22 = vrot.slane %v826_v3, 4  ;;  %v831_v23 = vrot.slane %v829_v4, 5  ;;  %v809_v26 = vrot.slane %v808_v7, 4  ;;  %v5017_v42 = vld [vmem:[%s6514_s1] sm:$0xff]   ;;  %v675_v4 = vld [vmem:[%s5182_s8 + $0xa8] sm:$0xff] }
  0x29   : > { %v5356_v27 = vrot.slane %v818_v9, 4  ;;  %v837_v30 = vrot.slane %v835_v10, 5  ;;  %v841_v31 = vrot.slane %v839_v13, 4  ;;  %v845_v39 = vshll.u32 %v671_v15, 16  ;;  %4531 = vmatpush3.bf16.msra.mxu0 %v5017_v42  ;;  %v5020_v10 = vld [vmem:[%s6514_s1 + $0x50] sm:$0xff]  }
  0x2a   : > { %v850_v40 = vshrl.u32 %v5345_v16, 16  ;;  %v832_v43 = vor.u32 %v831_v23, %v828_v22  ;;  %v853_v44 = vshll.u32 %v5345_v16, 16  ;;  %v859_v45 = vshll.u32 %v5349_v18, 16  ;;  %v5021_v13 = vld [vmem:[%s6514_s1 + $0x10] sm:$0xff]  }
  0x2b   : > { %4869 = vmatpush3.bf16.msra.mxu1 %v5007_v35  ;;  %v5014_v35 = vld [vmem:[%s6514_s1 + $0x1e8] sm:$0xff]   ;;  %v5375_v47 = vsel %vm5229_vm2, %v809_v26, %v813_v59  ;;  %v842_v49 = vor.u32 %v841_v31, %v837_v30  ;;  %v3893_v53 = vcombine.low %v5326_v0, %v5331_v1  ;;  %v847_v55 = vrot.slane %v845_v39, 5  ;;  %v5022_v31 = vld [vmem:[%s6514_s1 + $0x58] sm:$0xff]  }
  0x2c   : > { %4870 = vmatprep.subr.bf16.mxu1 %v5008_v46  ;;  %v5016_v46 = vld [vmem:[%s6514_s1 + $0x1a8] sm:$0xff]   ;;  %v852_v57 = vrot.slane %v850_v40, 4  ;;  %v833_v61 = vrot.slane %v832_v43, 4  ;;  %v855_v63 = vrot.slane %v853_v44, 5  ;;  %v861_v3 = vrot.slane %v859_v45, 5  ;;  %v5023_v39 = vld [vmem:[%s6514_s1 + $0x18] sm:$0xff]  }
  0x2d   : > { %v5393_v7 = vrot.slane %v842_v49, 4  ;;  %v877_v15 = vshll.u32 %v675_v4, 16  ;;  %v677_v40 = vld [vmem:[%s5182_s8 + $0xb8] sm:$0x11]  ;;  %v5024_v45 = vld [vmem:[%s6514_s1 + $0x1f0] sm:$0xff]  }
  0x2e   : > { %1387 = vmatmul.mubr.bf16.gmra.mrb[4].mxu1 %v3889_v48  ;;  %v824_v48 = vsel %vm5229_vm2, %v5356_v27, %v823_v21  ;;  %v678_v21 = vld [vmem:[%s5182_s8 + $0xc0] sm:$0xff]  ;;  %v5404_v22 = vsel %vm5229_vm2, %v833_v61, %v837_v30 }
  0x2f   : > { %1394 = vmatprep.mubr.bf16.mxu1 %v3892_v52  ;;  %4871 = vmatpush3.bf16.msra.mxu1 %v5009_v50  ;;  %v863_v50 = vshrl.u32 %v5349_v18, 16  ;;  %v5018_v52 = vld [vmem:[%s6514_s1 + $0x48] sm:$0xff]   ;;  %v3896_v59 = vcombine.high %v5375_v47, %v824_v48  ;;  %v848_v23 = vsel %vm5229_vm2, %v5393_v7, %v847_v55  ;;  %v879_v43 = vrot.slane %v877_v15, 5 }
  0x30   : > { %4872 = vmatprep.subr.bf16.mxu1 %v5010_v56  ;;  %v674_v56 = vld [vmem:[%s5182_s8 + $0xa0] sm:$0x11]  ;;  %4532 = vmatprep.subr.bf16.mxu0 %v5018_v52  ;;  %v898_v44 = vshrl.u32 %v678_v21, 16  ;;  %v907_v55 = vshll.u32 %v679_v38, 16 }
  0x31   : > { %v865_v1 = vrot.slane %v863_v50, 4  ;;  %4533 = vmatpush3.bf16.msra.mxu0 %v5019_v58  ;;  %v869_v9 = vshll.u32 %v674_v56, 16  ;;  %v901_v50 = vshll.u32 %v678_v21, 16  ;;  %v911_v56 = vshrl.u32 %v679_v38, 16 }
  0x32   : > { %4534 = vmatprep.subr.bf16.mxu0 %v5020_v10  ;;  %v3897_v21 = vcombine.low %v5404_v22, %v848_v23 }
  0x33   : > { %4873 = vmatpush3.bf16.msra.mxu1 %v5011_v6  ;;  %v676_v6 = vld [vmem:[%s5182_s8 + $0xb0] sm:$0xff]  ;;  %v866_v26 = vor.u32 %v865_v1, %v861_v3  ;;  %v871_v30 = vrot.slane %v869_v9, 5  ;;  %v5027_v9 = vld [vmem:[%s6514_s1 + $0x20] sm:$0xff]   ;;  %v913_v15 = vrot.slane %v911_v56, 4 }
  0x34   : > { %4874 = vmatprep.subr.bf16.mxu1 %v5012_v14  ;;  %v874_v14 = vshrl.u32 %v675_v4, 16  ;;  %v900_v4 = vrot.slane %v898_v44, 4  ;;  %v5026_v1 = vld [vmem:[%s6514_s1 + $0x1b0] sm:$0xff]  }
  0x35   : > { %4535 = vmatpush3.bf16.msra.mxu0 %v5021_v13 }
  0x36   : > { %1395 = vmatmul.mubr.bf16.gmra.mrb[8].mxu1 %v3891_v17  ;;  %v883_v17 = vshll.u32 %v676_v6, 16  ;;  %v876_v42 = vrot.slane %v874_v14, 4  ;;  %4536 = vmatprep.subr.bf16.mxu0 %v5022_v31  ;;  %v909_v14 = vrot.slane %v907_v55, 5 }
  0x37   : > { %1402 = vmatprep.mubr.bf16.mxu1 %v3894_v19  ;;  %4875 = vmatpush3.bf16.msra.mxu1 %v5013_v24  ;;  %v887_v19 = vshrl.u32 %v676_v6, 16  ;;  %v856_v24 = vor.u32 %v855_v63, %v852_v57  ;;  %v5025_v57 = vld [vmem:[%s6514_s1 + $0x60] sm:$0xff]   ;;  %v893_v63 = vshll.u32 %v677_v40, 16  ;;  %v903_v6 = vrot.slane %v901_v50, 5 }
  0x38   : > { %4876 = vmatprep.subr.bf16.mxu1 %v5014_v35  ;;  %v3895_v35 = vcombine.low %v5375_v47, %v824_v48  ;;  %v885_v49 = vrot.slane %v883_v17, 5  ;;  %v880_v58 = vor.u32 %v879_v43, %v876_v42  ;;  %v5028_v17 = vld [vmem:[%s6514_s1 + $0x68] sm:$0xff]   ;;  %v684_v42 = vld [vmem:[%s5182_s8 + $0xf0] sm:$0xff] }
  0x39   : > { %v889_v48 = vrot.slane %v887_v19, 4  ;;  %v857_v52 = vrot.slane %v856_v24, 4  ;;  %4537 = vmatpush3.bf16.msra.mxu0 %v5023_v39  ;;  %v681_v19 = vld [vmem:[%s5182_s8 + $0xd8] sm:$0xff]  ;;  %v904_v38 = vor.u32 %v903_v6, %v900_v4  ;;  %v682_v39 = vld [vmem:[%s5182_s8 + $0xe0] sm:$0xff]  ;;  %v5029_v43 = vld [vmem:[%s6514_s1 + $0x28] sm:$0xff]   ;;  %v946_v55 = vshrl.u32 %v684_v42, 16 }
  0x3a   : > { %4538 = vmatprep.subr.bf16.mxu0 %v5025_v57  ;;  %v881_v24 = vrot.slane %v880_v58, 4  ;;  %v922_v40 = vshrl.u32 %v681_v19, 16  ;;  %v925_v44 = vshll.u32 %v681_v19, 16  ;;  %v949_v56 = vshll.u32 %v684_v42, 16  ;;  %v5030_v57 = vld [vmem:[%s6514_s1 + $0x70] sm:$0xff]  }
  0x3b   : > { %4877 = vmatpush3.bf16.msra.mxu1 %v5016_v46  ;;  %v3898_v46 = vcombine.high %v5404_v22, %v848_v23  ;;  %v890_v61 = vor.u32 %v889_v48, %v885_v49  ;;  %v5434_v10 = vsel %vm5229_vm2, %v857_v52, %v861_v3  ;;  %v935_v48 = vshrl.u32 %v682_v39, 16  ;;  %v686_v6 = vld [vmem:[%s5182_s8 + $0x100] sm:$0x11] }
  0x3c   : > { %4878 = vmatprep.subr.bf16.mxu1 %v5024_v45  ;;  %v5451_v23 = vsel %vm5229_vm2, %v881_v24, %v885_v49  ;;  %v905_v52 = vrot.slane %v904_v38, 4  ;;  %v5031_v49 = vld [vmem:[%s6514_s1 + $0x30] sm:$0xff]   ;;  %v927_v4 = vrot.slane %v925_v44, 5  ;;  %v951_v24 = vrot.slane %v949_v56, 5  ;;  %v5036_v38 = vld [vmem:[%s6514_s1 + $0x1f8] sm:$0xff]   ;;  %v5038_v56 = vld [vmem:[%s6514_s1 + $0x140] sm:$0xff]  }
  0x3d   : > { %4539 = vmatpush3.bf16.msra.mxu0 %v5027_v9  ;;  %v891_v31 = vrot.slane %v890_v61, 4  ;;  %v924_v61 = vrot.slane %v922_v40, 4  ;;  %v965_v44 = vshll.u32 %v686_v6, 16  ;;  %v5521_v6 = vld [vmem:[%s5182_s8 + $0x118] sm:$0x11] }
  0x3e   : > { %1403 = vmatmul.mubr.bf16.gmra.mrb[12].mxu1 %v3893_v53  ;;  %v867_v53 = vrot.slane %v866_v26, 4  ;;  %4540 = vmatprep.subr.bf16.mxu0 %v5028_v17  ;;  %v937_v17 = vrot.slane %v935_v48, 4  ;;  %v3810_v48 = vcombine.high %v5212_v28, %v5215_v29 }
  0x3f   : > { %1410 = vmatprep.mubr.bf16.mxu1 %v3896_v59  ;;  %v680_v59 = vld [vmem:[%s5182_s8 + $0xd0] sm:$0x11]  ;;  %4879 = vmatpush3.bf16.msra.mxu1 %v5026_v1  ;;  %v5032_v1 = vld [vmem:[%s6514_s1 + $0x78] sm:$0xff]   ;;  %v928_v40 = vor.u32 %v927_v4, %v924_v61 }
  0x40   : > { %v872_v13 = vsel %vm5229_vm2, %v867_v53, %v871_v30  ;;  %v917_v26 = vshll.u32 %v680_v59, 16  ;;  %v914_v30 = vor.u32 %v913_v15, %v909_v14  ;;  %v685_v53 = vld [vmem:[%s5182_s8 + $0xf8] sm:$0xff]  ;;  %v683_v59 = vld [vmem:[%s5182_s8 + $0xe8] sm:$0x11]  ;;  %4880 = vmatprep.subr.bf16.mxu1 %v5036_v38 }
  0x41   : > { %v3900_v3 = vcombine.high %v5434_v10, %v872_v13  ;;  %4541 = vmatpush3.bf16.msra.mxu0 %v5029_v43  ;;  %v955_v19 = vshll.u32 %v685_v53, 16  ;;  %v941_v42 = vshll.u32 %v683_v59, 16 }
  0x42   : > { %v919_v45 = vrot.slane %v917_v26, 5  ;;  %v915_v58 = vrot.slane %v914_v30, 4  ;;  %4542 = vmatprep.subr.bf16.mxu0 %v5030_v57  ;;  %v687_v26 = vld [vmem:[%s5182_s8 + $0x108] sm:$0xff] }
  0x43   : > { %v5496_v43 = vrot.slane %v955_v19, 5  ;;  %v943_v4 = vrot.slane %v941_v42, 5  ;;  %v5526_v19 = vrot.slane %v965_v44, 5  ;;  %v3812_v42 = vcombine.high %v5225_v36, %v5235_v41  ;;  %v4085_v44 = vld [vmem:[%s5182_s8 + $0x40] sm:$0x11] }
  0x44   : > { %v5494_v30 = vsel %vm5229_vm2, %v915_v58, %v919_v45  ;;  %v3813_v58 = vcombine.low %v5250_v60, %v5256_v2 }
  0x45   : > { %4543 = vmatpush3.bf16.msra.mxu0 %v5031_v49  ;;  %v5039_v49 = vld [vmem:[%s6514_s1 + $0x100] sm:$0xff]  }
  0x46   : > { %1411 = vmatmul.mubr.bf16.gmra.mrb[16].mxu1 %v3895_v35  ;;  %v895_v35 = vrot.slane %v893_v63, 5  ;;  %v3899_v63 = vcombine.low %v5434_v10, %v872_v13  ;;  %4544 = vmatprep.subr.bf16.mxu0 %v5032_v1  ;;  %v5033_v10 = vld [vmem:[%s6514_s1 + $0x38] sm:$0xff]   ;;  %v3809_v13 = vcombine.low %v5212_v28, %v5215_v29  ;;  %v5524_v1 = vld [vmem:[%s5182_s8 + $0x120] sm:$0xff] }
  0x47   : > { %1418 = vmatprep.mubr.bf16.mxu1 %v3898_v46  ;;  %v931_v46 = vshll.u32 %v682_v39, 16  ;;  %v5490_v39 = vsel %vm5229_vm2, %v905_v52, %v909_v14  ;;  %v973_v52 = vshll.u32 %v687_v26, 16  ;;  %v994_v38 = vshrl.u32 %v5524_v1, 16 }
  0x48   : > { %v5455_v50 = vsel %vm5229_vm2, %v891_v31, %v895_v35  ;;  %v959_v31 = vshrl.u32 %v685_v53, 16  ;;  %v5483_v35 = vld [vmem:[%s5182_s8 + $0x110] sm:$0xff]  ;;  %v3904_v61 = vcombine.high %v5490_v39, %v5494_v30 }
  0x49   : > { %v3902_v9 = vcombine.high %v5451_v23, %v5455_v50  ;;  %v5472_v15 = vrot.slane %v931_v46, 5  ;;  %v970_v46 = vshrl.u32 %v687_v26, 16  ;;  %4545 = vmatpush3.bf16.msra.mxu0 %v5033_v10  ;;  %v979_v45 = vshll.u32 %v5483_v35, 16  ;;  %v5045_v26 = vld [vmem:[%s6514_s1 + $0x108] sm:$0xff]  }
  0x4a   : > { %v961_v57 = vrot.slane %v959_v31, 4  ;;  %v3901_v59 = vcombine.low %v5451_v23, %v5455_v50  ;;  %4754 = vmatprep.subr.bf16.mxu0 %v5038_v56  ;;  %v983_v10 = vshrl.u32 %v5483_v35, 16  ;;  %v989_v31 = vshll.u32 %v5521_v6, 16  ;;  %v5069_v6 = vld [vmem:[%s6514_s1 + $0x128] sm:$0xff]  }
  0x4b   : > { %v938_v53 = vor.u32 %v937_v17, %v5472_v15  ;;  %v5535_v50 = vrot.slane %v970_v46, 4  ;;  %v3817_v46 = vcombine.low %v5313_v51, %v5322_v62 }
  0x4c   : > { %526 = vmatmul.mubr.bf16.vlgmr.msra.gmra.mrb[0].mxu0 %v3807_v20  ;;  %v3815_v20 = vcombine.low %v5285_v32, %v5288_v33  ;;  %v962_v23 = vor.u32 %v961_v57, %v5496_v43  ;;  %v3903_v57 = vcombine.low %v5490_v39, %v5494_v30  ;;  %v5585_v39 = vld [vmem:[%s5182_s8 + $0x128] sm:$0xff] }
  0x4d   : > { %533 = vmatprep.mubr.bf16.mxu0 %v3810_v48  ;;  %4755 = vmatpush3.bf16.msra.mxu0 %v5039_v49  ;;  %v4094_v30 = vld [vmem:[%s5182_s8 + $0x88] sm:$0x11] }
  0x4e   : > { %1419 = vmatmul.mubr.bf16.gmra.mrb[20].mxu1 %v3897_v21  ;;  %v948_v21 = vrot.slane %v946_v55, 4  ;;  %v5037_v55 = vld [vmem:[%s6514_s1 + $0x1b8] sm:$0xff]   ;;  %4756 = vmatprep.subr.bf16.mxu0 %v5044_v12  ;;  %v963_v49 = vrot.slane %v962_v23, 4  ;;  %v2609_v23 = vshll.u32 %v4094_v30, 16 }
  0x4f   : > { %1426 = vmatprep.mubr.bf16.mxu1 %v3900_v3  ;;  %v3811_v3 = vcombine.low %v5225_v36, %v5235_v41  ;;  %4881 = vmatpush3.bf16.msra.mxu1 %v5037_v55  ;;  %v2537_v55 = vshll.u32 %v4085_v44, 16  ;;  %v692_v41 = vld [vmem:[%s5182_s8 + $0x130] sm:$0x11] }
  0x50   : > { %v952_v14 = vor.u32 %v951_v24, %v948_v21  ;;  %v5537_v21 = vrot.slane %v973_v52, 5  ;;  %v5539_v24 = vrot.slane %v979_v45, 5  ;;  %v997_v45 = vshll.u32 %v5524_v1, 16 }
  0x51   : > { %4757 = vmatpush3.bf16.msra.mxu0 %v5045_v26  ;;  %v5057_v26 = vld [vmem:[%s6514_s1 + $0x118] sm:$0xff]  }
  0x52   : > { %v953_v17 = vrot.slane %v952_v14, 4  ;;  %v5050_v14 = vld [vmem:[%s6514_s1 + $0x150] sm:$0xff]  }
  0x53   : > { %4758 = vmatprep.subr.bf16.mxu0 %v5050_v14  ;;  %v968_v14 = vsel %vm5229_vm2, %v963_v49, %v5526_v19 }
  0x54   : > { %534 = vmatmul.mubr.bf16.gmra.mrb[4].mxu0 %v3809_v13  ;;  %v4091_v13 = vld [vmem:[%s5182_s8 + $0x70] sm:$0x11] }
  0x55   : > { %541 = vmatprep.mubr.bf16.mxu0 %v3812_v42  ;;  %v2585_v12 = vshll.u32 %v4091_v13, 16  ;;  %v5063_v13 = vld [vmem:[%s6514_s1 + $0x120] sm:$0xff]  }
  0x56   : > { %1427 = vmatmul.mubr.bf16.gmra.mrb[24].mxu1 %v3899_v63  ;;  %v929_v63 = vrot.slane %v928_v40, 4  ;;  %v2513_v40 = vshll.u32 %v4082_v11, 16 }
  0x57   : > { %1434 = vmatprep.mubr.bf16.mxu1 %v3902_v9  ;;  %v939_v9 = vrot.slane %v938_v53, 4  ;;  %v4088_v53 = vld [vmem:[%s5182_s8 + $0x58] sm:$0x11] }
  0x58   : > { %v5555_v48 = vsel %vm5229_vm2, %v929_v63, %v5472_v15  ;;  %v2515_v35 = vrot.slane %v2513_v40, 5  ;;  %v2561_v56 = vshll.u32 %v4088_v53, 16  ;;  %v5051_v15 = vld [vmem:[%s6514_s1 + $0x110] sm:$0xff]   ;;  %v5056_v63 = vld [vmem:[%s6514_s1 + $0x158] sm:$0xff]   ;;  %v976_v40 = vor.u32 %v5537_v21, %v5535_v50 }
  0x59   : > { %v5563_v52 = vsel %vm5229_vm2, %v939_v9, %v943_v4  ;;  %v985_v4 = vrot.slane %v983_v10, 4  ;;  %4759 = vmatpush3.bf16.msra.mxu0 %v5051_v15  ;;  %v5601_v10 = vsel %vm5229_vm2, %v953_v17, %v5496_v43  ;;  %v2587_v17 = vrot.slane %v2585_v12, 5 }
  0x5a   : > { %v3906_v9 = vcombine.high %v5555_v48, %v5563_v52  ;;  %v2563_v11 = vrot.slane %v2561_v56, 5  ;;  %4760 = vmatprep.subr.bf16.mxu0 %v5056_v63  ;;  %v3814_v50 = vcombine.high %v5250_v60, %v5256_v2  ;;  %v2611_v53 = vrot.slane %v2609_v23, 5 }
  0x5b   : > { %v5633_v56 = vsel %vm5229_vm2, %v5356_v27, %v2587_v17  ;;  %v986_v15 = vor.u32 %v985_v4, %v5539_v24  ;;  %v5062_v27 = vld [vmem:[%s6514_s1 + $0x160] sm:$0xff]   ;;  %v996_v63 = vrot.slane %v994_v38, 4  ;;  %v999_v4 = vrot.slane %v997_v45, 5 }
  0x5c   : > { %v5617_v43 = vsel %vm5229_vm2, %v5316_v54, %v2563_v11  ;;  %v1003_v54 = vshll.u32 %v5585_v39, 16  ;;  %v4166_v19 = vcombine.low %v5375_v47, %v5633_v56  ;;  %v5643_v49 = vsel %vm5229_vm2, %v5393_v7, %v2611_v53  ;;  %542 = vmatmul.mubr.bf16.gmra.mrb[8].mxu0 %v3811_v3  ;;  %v5668_v45 = vld [vmem:[%s5182_s8 + $0x140] sm:$0xff] }
  0x5d   : > { %v4164_v21 = vcombine.low %v5326_v0, %v5617_v43  ;;  %4761 = vmatpush3.bf16.msra.mxu0 %v5057_v26  ;;  %v4168_v7 = vcombine.low %v5404_v22, %v5643_v49  ;;  %v3905_v30 = vcombine.low %v5555_v48, %v5563_v52  ;;  %549 = vmatprep.mubr.bf16.mxu0 %v3814_v50  ;;  %v977_v11 = vrot.slane %v976_v40, 4  ;;  %v5068_v48 = vld [vmem:[%s6514_s1 + $0x168] sm:$0xff]  }
  0x5e   : > { %1435 = vmatmul.mubr.bf16.gmra.mrb[28].mxu1 %v3901_v59  ;;  %v5577_v59 = vsel %vm5229_vm2, %v5261_v5, %v2515_v35  ;;  %v2539_v5 = vrot.slane %v2537_v55, 5  ;;  %v1007_v55 = vshrl.u32 %v5585_v39, 16  ;;  %4762 = vmatprep.subr.bf16.mxu0 %v5062_v27  ;;  %v3908_v36 = vcombine.high %v5601_v10, %v968_v14  ;;  %v695_v27 = vld [vmem:[%s5182_s8 + $0x148] sm:$0x11] }
  0x5f   : > { %1442 = vmatprep.mubr.bf16.mxu1 %v3904_v61  ;;  %v3819_v61 = vcombine.low %v5345_v16, %v5349_v18  ;;  %v4160_v28 = vcombine.low %v5265_v8, %v5577_v59  ;;  %v4161_v29 = vcombine.high %v5265_v8, %v5577_v59  ;;  %v1005_v3 = vrot.slane %v1003_v54, 5 }
  0x60   : > { %v5608_v42 = vsel %vm5229_vm2, %v5281_v25, %v2539_v5  ;;  %v4165_v25 = vcombine.high %v5326_v0, %v5617_v43  ;;  %v4169_v5 = vcombine.high %v5404_v22, %v5643_v49  ;;  %v1009_v38 = vrot.slane %v1007_v55, 4 }
  0x61   : > { %v4163_v44 = vcombine.high %v5292_v34, %v5608_v42  ;;  %v4162_v35 = vcombine.low %v5292_v34, %v5608_v42  ;;  %4763 = vmatpush3.bf16.msra.mxu0 %v5063_v13  ;;  %v987_v12 = vrot.slane %v986_v15, 4  ;;  %v991_v23 = vrot.slane %v989_v31, 5 }
  0x62   : > { %v1000_v52 = vor.u32 %v999_v4, %v996_v63  ;;  %v1027_v50 = vshll.u32 %v5668_v45, 16  ;;  %v1031_v53 = vshrl.u32 %v5668_v45, 16  ;;  %v3816_v40 = vcombine.high %v5285_v32, %v5288_v33  ;;  %4764 = vmatprep.subr.bf16.mxu0 %v5068_v48  ;;  %v5695_v48 = vld [vmem:[%s5182_s8 + $0x150] sm:$0xff]  ;;  %v5721_v33 = vld [vmem:[%s5182_s8 + $0x168] sm:$0xff] }
  0x63   : > { %v1010_v31 = vor.u32 %v1009_v38, %v1005_v3  ;;  %v1013_v54 = vshll.u32 %v692_v41, 16  ;;  %v982_v55 = vsel %vm5229_vm2, %v977_v11, %v5539_v24  ;;  %v992_v15 = vsel %vm5229_vm2, %v987_v12, %v991_v23  ;;  %v5698_v12 = vld [vmem:[%s5182_s8 + $0x158] sm:$0xff]  ;;  %v5075_v32 = vld [vmem:[%s6514_s1 + $0x130] sm:$0xff]  }
  0x64   : > { %v3907_v63 = vcombine.low %v5601_v10, %v968_v14  ;;  %v1001_v4 = vrot.slane %v1000_v52, 4  ;;  %550 = vmatmul.mubr.bf16.gmra.mrb[12].mxu0 %v3813_v58  ;;  %v1033_v41 = vrot.slane %v1031_v53, 4  ;;  %v3910_v38 = vcombine.high %v982_v55, %v992_v15  ;;  %v5074_v53 = vld [vmem:[%s6514_s1 + $0x170] sm:$0xff]  }
  0x65   : > { %4765 = vmatpush3.bf16.msra.mxu0 %v5069_v6  ;;  %557 = vmatprep.mubr.bf16.mxu0 %v3816_v40  ;;  %v1011_v24 = vrot.slane %v1010_v31, 4  ;;  %v1015_v11 = vrot.slane %v1013_v54, 5  ;;  %v1037_v14 = vshll.u32 %v695_v27, 16  ;;  %v1042_v2 = vshrl.u32 %v5695_v48, 16  ;;  %v698_v27 = vld [vmem:[%s5182_s8 + $0x160] sm:$0x11] }
  0x66   : > { %1443 = vmatmul.mubr.bf16.gmra.mrb[32].mxu1 %v3903_v57  ;;  %v4167_v57 = vcombine.high %v5375_v47, %v5633_v56  ;;  %v1006_v10 = vsel %vm5229_vm2, %v1001_v4, %v1005_v3  ;;  %v3818_v58 = vcombine.high %v5313_v51, %v5322_v62  ;;  %v1055_v3 = vshrl.u32 %v5698_v12, 16  ;;  %4766 = vmatprep.subr.bf16.mxu0 %v5074_v53  ;;  %v5740_v53 = vld [vmem:[%s5182_s8 + $0xa8] sm:$0xff] }
  0x67   : > { %1450 = vmatprep.mubr.bf16.mxu1 %v3906_v9  ;;  %v5663_v9 = vld [vmem:[%s5182_s8 + $0x138] sm:$0xff]  ;;  %v1016_v52 = vsel %vm5229_vm2, %v1011_v24, %v1015_v11  ;;  %v3909_v40 = vcombine.low %v982_v55, %v992_v15  ;;  %v1061_v15 = vshll.u32 %v698_v27, 16  ;;  %v3831_v51 = vcombine.low %v5524_v1, %v5585_v39 }
  0x68   : > { %v1018_v26 = vshrl.u32 %v5663_v9, 16  ;;  %v1021_v17 = vshll.u32 %v5663_v9, 16  ;;  %v3912_v6 = vcombine.high %v1006_v10, %v1016_v52  ;;  %v3832_v59 = vcombine.high %v5524_v1, %v5585_v39 }
  0x69   : > { %4767 = vmatpush3.bf16.msra.mxu0 %v5075_v32  ;;  %v5080_v32 = vld [vmem:[%s6514_s1 + $0x178] sm:$0xff]  }
  0x6a   : > { %v1020_v13 = vrot.slane %v1018_v26, 4  ;;  %v1045_v26 = vshll.u32 %v5695_v48, 16  ;;  %4768 = vmatprep.subr.bf16.mxu0 %v5080_v32  ;;  %v5853_v32 = vld [vmem:[%s5182_s8 + $0x98] sm:$0xff] }
  0x6c   : > { %558 = vmatmul.mubr.bf16.gmra.mrb[16].mxu0 %v3815_v20  ;;  %v1047_v4 = vrot.slane %v1045_v26, 5  ;;  %v5724_v20 = vld [vmem:[%s5182_s8 + $0x170] sm:$0xff] }
  0x6d   : > { %565 = vmatprep.mubr.bf16.mxu0 %v3818_v58 }
  0x6e   : > { %1451 = vmatmul.mubr.bf16.gmra.mrb[36].mxu1 %v3905_v30  ;;  %v1023_v30 = vrot.slane %v1021_v17, 5  ;;  %v1051_v17 = vshll.u32 %v5698_v12, 16 }
  0x6f   : > { %1458 = vmatprep.mubr.bf16.mxu1 %v3908_v36  ;;  %v1029_v36 = vrot.slane %v1027_v50, 5  ;;  %v1039_v50 = vrot.slane %v1037_v14, 5  ;;  %v1066_v14 = vshrl.u32 %v5721_v33, 16 }
  0x70   : > { %v1024_v23 = vor.u32 %v1023_v30, %v1020_v13  ;;  %v1053_v13 = vrot.slane %v1051_v17, 5  ;;  %v1057_v30 = vrot.slane %v1055_v3, 4  ;;  %v1063_v3 = vrot.slane %v1061_v15, 5 }
  0x71   : > { %v1034_v60 = vor.u32 %v1033_v41, %v1029_v36  ;;  %v3820_v41 = vcombine.high %v5345_v16, %v5349_v18 }
  0x72   : > { %v1025_v31 = vrot.slane %v1024_v23, 4  ;;  %v1058_v11 = vor.u32 %v1057_v30, %v1053_v13  ;;  %v1069_v23 = vshll.u32 %v5721_v33, 16  ;;  %v3833_v30 = vcombine.low %v5663_v9, %v5668_v45 }
  0x73   : > { %v1035_v54 = vrot.slane %v1034_v60, 4  ;;  %v1075_v60 = vshll.u32 %v5724_v20, 16 }
  0x74   : > { %v1030_v55 = vsel %vm5229_vm2, %v1025_v31, %v1029_v36  ;;  %v1079_v36 = vshrl.u32 %v5724_v20, 16  ;;  %566 = vmatmul.mubr.bf16.gmra.mrb[20].mxu0 %v3817_v46  ;;  %v1059_v17 = vrot.slane %v1058_v11, 4  ;;  %v1071_v31 = vrot.slane %v1069_v23, 5  ;;  %v5081_v11 = vld [vmem:[%s6514_s1 + $0x138] sm:$0xff]  }
  0x75   : > { %573 = vmatprep.mubr.bf16.mxu0 %v3820_v41  ;;  %v5766_v41 = vld [vmem:[%s5182_s8 + $0xc0] sm:$0xff]  ;;  %4769 = vmatpush3.bf16.msra.mxu0 %v5081_v11 }
  0x76   : > { %1459 = vmatmul.mubr.bf16.gmra.mrb[40].mxu1 %v3907_v63  ;;  %v1044_v63 = vrot.slane %v1042_v2, 4  ;;  %v3911_v2 = vcombine.low %v1006_v10, %v1016_v52  ;;  %v1081_v27 = vrot.slane %v1079_v36, 4  ;;  %v1064_v52 = vsel %vm5229_vm2, %v1059_v17, %v1063_v3  ;;  %v5796_v17 = vld [vmem:[%s5182_s8 + $0xe0] sm:$0xff] }
  0x77   : > { %1466 = vmatprep.mubr.bf16.mxu1 %v3910_v38  ;;  %v1040_v38 = vsel %vm5229_vm2, %v1035_v54, %v1039_v50  ;;  %v1068_v50 = vrot.slane %v1066_v14, 4  ;;  %v1077_v54 = vrot.slane %v1075_v60, 5  ;;  %v3837_v36 = vcombine.low %v5721_v33, %v5724_v20 }
  0x78   : > { %v1048_v24 = vor.u32 %v1047_v4, %v1044_v63  ;;  %v3914_v58 = vcombine.high %v1030_v55, %v1040_v38  ;;  %v3913_v15 = vcombine.low %v1030_v55, %v1040_v38  ;;  %v2662_v39 = vshrl.u32 %v5766_v41, 16 }
  0x79   : > { %v1072_v63 = vor.u32 %v1071_v31, %v1068_v50  ;;  %v1082_v4 = vor.u32 %v1081_v27, %v1077_v54  ;;  %v5809_v31 = vld [vmem:[%s5182_s8 + $0xf0] sm:$0xff]  ;;  %v2695_v22 = vshll.u32 %v5796_v17, 16  ;;  %v2699_v49 = vshrl.u32 %v5796_v17, 16 }
  0x7a   : > { %v1049_v26 = vrot.slane %v1048_v24, 4  ;;  %v5769_v24 = vld [vmem:[%s5182_s8 + $0xc8] sm:$0xff] }
  0x7b   : > { %v1073_v14 = vrot.slane %v1072_v63, 4  ;;  %v1083_v16 = vrot.slane %v1082_v4, 4  ;;  %v5782_v38 = vcombine.high %v5766_v41, %v5769_v24  ;;  %v5800_v3 = vcombine.low %v5766_v41, %v5769_v24 }
  0x7c   : > { %v1054_v46 = vsel %vm5229_vm2, %v1049_v26, %v1053_v13  ;;  %574 = vmatmul.mubr.bf16.gmra.mrb[24].mxu0 %v3819_v61  ;;  %v3835_v61 = vcombine.low %v5695_v48, %v5698_v12  ;;  %v5793_v26 = vld [vmem:[%s5182_s8 + $0xd8] sm:$0xff]  ;;  %v2671_v56 = vshll.u32 %v5769_v24, 16 }
  0x7d   : > { %v3916_v13 = vcombine.high %v1054_v46, %v1064_v52  ;;  %v1078_v23 = vsel %vm5229_vm2, %v1073_v14, %v1077_v54  ;;  %v5804_v50 = vcombine.high %v5793_v26, %v5796_v17  ;;  %v5812_v54 = vld [vmem:[%s5182_s8 + $0xf8] sm:$0xff]  ;;  %v5816_v27 = vcombine.low %v5793_v26, %v5796_v17  ;;  %v4097_v14 = vld [vmem:[%s5182_s8 + $0xa0] sm:$0x11] }
  0x7e   : > { %1467 = vmatmul.mubr.bf16.gmra.mrb[44].mxu1 %v3909_v40  ;;  %v5743_v40 = vld [vmem:[%s5182_s8 + $0xb0] sm:$0xff]  ;;  %v5835_v63 = vcombine.low %v5809_v31, %v5812_v54  ;;  %v2713_v17 = vshll.u32 %v5809_v31, 16 }
  0x7f   : > { %1474 = vmatprep.mubr.bf16.mxu1 %v3912_v6  ;;  %v701_v6 = vld [vmem:[%s5182_s8 + $0x178] sm:$0x11]  ;;  %v5750_v62 = vcombine.high %v5740_v53, %v5743_v40  ;;  %v5778_v55 = vcombine.low %v5740_v53, %v5743_v40 }
  0x80   : > { %v1085_v10 = vshll.u32 %v701_v6, 16 }
  0x81   : > { %581 = vmatprep.mubr.bf16.mxu0 %v5750_v62 }
  0x82   : > { %v1087_v18 = vrot.slane %v1085_v10, 5  ;;  %v5828_v10 = vld [vmem:[%s5182_s8 + $0x108] sm:$0xff] }
  0x84   : > { %v1088_v60 = vsel %vm5229_vm2, %v1083_v16, %v1087_v18  ;;  %582 = vmatmul.mubr.bf16.gmra.mrb[28].mxu0 %v5778_v55  ;;  %v2641_v16 = vshll.u32 %v5740_v53, 16  ;;  %v3834_v18 = vcombine.high %v5663_v9, %v5668_v45  ;;  %v3838_v9 = vcombine.high %v5721_v33, %v5724_v20 }
  0x85   : > { %589 = vmatprep.mubr.bf16.mxu0 %v5782_v38  ;;  %v3917_v6 = vcombine.low %v1078_v23, %v1088_v60  ;;  %v2734_v20 = vshrl.u32 %v5828_v10, 16 }
  0x86   : > { %1475 = vmatmul.mubr.bf16.gmra.mrb[48].mxu1 %v3911_v2  ;;  %v3915_v2 = vcombine.low %v1054_v46, %v1064_v52  ;;  %v5820_v46 = vcombine.high %v5809_v31, %v5812_v54  ;;  %v5831_v52 = vld [vmem:[%s5182_s8 + $0x110] sm:$0xff]  ;;  %v2643_v43 = vrot.slane %v2641_v16, 5 }
  0x87   : > { %1482 = vmatprep.mubr.bf16.mxu1 %v3914_v58  ;;  %v3918_v58 = vcombine.high %v1078_v23, %v1088_v60  ;;  %v5842_v4 = vcombine.high %v5828_v10, %v5831_v52  ;;  %v5857_v8 = vcombine.low %v5828_v10, %v5831_v52  ;;  %v2647_v23 = vshll.u32 %v5743_v40, 16  ;;  %v4103_v16 = vld [vmem:[%s5182_s8 + $0xd0] sm:$0x11] }
  0x88   : > { %v2651_v60 = vshrl.u32 %v5743_v40, 16 }
  0x8c   : > { %590 = vmatmul.mubr.bf16.gmra.mrb[32].mxu0 %v5800_v3 }
  0x8d   : > { %597 = vmatprep.mubr.bf16.mxu0 %v5804_v50 }
  0x8e   : > { %1483 = vmatmul.mubr.bf16.gmra.mrb[52].mxu1 %v3913_v15  ;;  %v2623_v15 = vshll.u32 %v5853_v32, 16 }
  0x8f   : > { %1490 = vmatprep.mubr.bf16.mxu1 %v3916_v13  ;;  %v2627_v13 = vshrl.u32 %v5853_v32, 16 }
  0x91   : > { %v2629_v11 = vrot.slane %v2627_v13, 4  ;;  %v3836_v13 = vcombine.high %v5695_v48, %v5698_v12  ;;  %v5086_v48 = vld [vmem:[%s5182_s8 + $0x1c] ss:$8 sps:$4 sm:$0xff]  }
  0x94   : > { %598 = vmatmul.mubr.bf16.gmra.mrb[36].mxu0 %v5816_v27 }
  0x95   : > { %605 = vmatprep.mubr.bf16.mxu0 %v5820_v46 }
  0x96   : > { %1491 = vmatmul.mubr.bf16.gmra.mrb[56].mxu1 %v3915_v2 }
  0x97   : > { %1498 = vmatprep.mubr.bf16.mxu1 %v3918_v58 }
  0x9c   : > { %606 = vmatmul.mubr.bf16.gmra.mrb[40].mxu0 %v5835_v63 }
  0x9d   : > { %613 = vmatprep.mubr.bf16.mxu0 %v5842_v4 }
  0x9e   : > { %1499 = vmatmul.mubr.bf16.gmra.mrb[60].mxu1 %v3917_v6  ;;  %v2633_v6 = vshll.u32 %v4097_v14, 16 }
  0x9f   : > { %3166 = vmatprep.mubr.bf16.mxu1 %v4161_v29  ;;  %v5850_v29 = vld [vmem:[%s5182_s8 + $0x90] sm:$0xff] }
  0xa4   : > { %614 = vmatmul.mubr.bf16.gmra.mrb[44].mxu0 %v5857_v8 }
  0xa5   : > { %621 = vmatprep.mubr.bf16.mxu0 %v3832_v59  ;;  %v2653_v59 = vrot.slane %v2651_v60, 4  ;;  %v2686_v60 = vshrl.u32 %v5793_v26, 16 }
  0xa6   : > { %3167 = vmatmul.mubr.bf16.vlgmr.msra.gmra.mrb[64].mxu1 %v4160_v28  ;;  %v2614_v28 = vshrl.u32 %v5850_v29, 16 }
  0xa7   : > { %3174 = vmatprep.mubr.bf16.mxu1 %v4163_v44  ;;  %v2617_v44 = vshll.u32 %v5850_v29, 16 }
  0xa8   : > { %v2616_v34 = vrot.slane %v2614_v28, 4 }
  0xa9   : > { %v2619_v42 = vrot.slane %v2617_v44, 5 }
  0xab   : > { %v2620_v2 = vor.u32 %v2619_v42, %v2616_v34 }
  0xac   : > { %622 = vmatmul.mubr.bf16.gmra.mrb[48].mxu0 %v3831_v51  ;;  %v2665_v51 = vshll.u32 %v5766_v41, 16  ;;  %v2664_v41 = vrot.slane %v2662_v39, 4 }
  0xad   : > { %629 = vmatprep.mubr.bf16.mxu0 %v3834_v18  ;;  %v2621_v28 = vrot.slane %v2620_v2, 4 }
  0xae   : > { %3175 = vmatmul.mubr.bf16.gmra.mrb[68].mxu1 %v4162_v35  ;;  %v2625_v35 = vrot.slane %v2623_v15, 5 }
  0xaf   : > { %3182 = vmatprep.mubr.bf16.mxu1 %v4165_v25  ;;  %v2638_v25 = vshrl.u32 %v5740_v53, 16  ;;  %v2649_v53 = vrot.slane %v2647_v23, 5  ;;  %v2681_v23 = vshll.u32 %v4103_v16, 16  ;;  %v5087_v16 = vld [vmem:[%s5182_s8 + $0x34] ss:$8 sps:$4 sm:$0xff]  }
  0xb0   : > { %v2630_v58 = vor.u32 %v2629_v11, %v2625_v35  ;;  %v2626_v34 = vsel %vm5229_vm2, %v2621_v28, %v2625_v35  ;;  %v2673_v35 = vrot.slane %v2671_v56, 5 }
  0xb1   : > { %v2640_v0 = vrot.slane %v2638_v25, 4  ;;  %v2654_v1 = vor.u32 %v2653_v59, %v2649_v53  ;;  %v2667_v25 = vrot.slane %v2665_v51, 5  ;;  %v4106_v59 = vld [vmem:[%s5182_s8 + $0xe8] sm:$0x11] }
  0xb2   : > { %v2631_v44 = vrot.slane %v2630_v58, 4  ;;  %v2689_v58 = vshll.u32 %v5793_v26, 16  ;;  %v2701_v26 = vrot.slane %v2699_v49, 4  ;;  %v2705_v12 = vshll.u32 %v4106_v59, 16 }
  0xb3   : > { %v2644_v40 = vor.u32 %v2643_v43, %v2640_v0  ;;  %v2655_v14 = vrot.slane %v2654_v1, 4  ;;  %v2683_v43 = vrot.slane %v2681_v23, 5 }
  0xb4   : > { %630 = vmatmul.mubr.bf16.gmra.mrb[52].mxu0 %v3833_v30  ;;  %v2668_v30 = vor.u32 %v2667_v25, %v2664_v41  ;;  %v2691_v28 = vrot.slane %v2689_v58, 5 }
  0xb5   : > { %637 = vmatprep.mubr.bf16.mxu0 %v3836_v13 }
  0xb6   : > { %3183 = vmatmul.mubr.bf16.gmra.mrb[72].mxu1 %v4164_v21  ;;  %v4100_v21 = vld [vmem:[%s5182_s8 + $0xb8] sm:$0x11]  ;;  %v2669_v0 = vrot.slane %v2668_v30, 4 }
  0xb7   : > { %3190 = vmatprep.mubr.bf16.mxu1 %v4167_v57  ;;  %v2635_v57 = vrot.slane %v2633_v6, 5  ;;  %v2657_v15 = vshll.u32 %v4100_v21, 16  ;;  %v2688_v21 = vrot.slane %v2686_v60, 4 }
  0xb9   : > { %v2636_v47 = vsel %vm5229_vm2, %v2631_v44, %v2635_v57  ;;  %v2659_v42 = vrot.slane %v2657_v15, 5  ;;  %v2697_v44 = vrot.slane %v2695_v22, 5  ;;  %v2710_v57 = vshrl.u32 %v5809_v31, 16  ;;  %v4112_v22 = vld [vmem:[%s5182_s8 + $0x118] sm:$0x11] }
  0xba   : > { %v4171_v11 = vcombine.high %v2626_v34, %v2636_v47  ;;  %v2674_v15 = vsel %vm5229_vm2, %v2669_v0, %v2673_v35  ;;  %v2692_v1 = vor.u32 %v2691_v28, %v2688_v21  ;;  %v5954_v0 = vld [vmem:[%s5182_s8 + $0x128] sm:$0xff]  ;;  %v2753_v28 = vshll.u32 %v4112_v22, 16 }
  0xbb   : > { %v2660_v45 = vsel %vm5229_vm2, %v2655_v14, %v2659_v42  ;;  %v2702_v39 = vor.u32 %v2701_v26, %v2697_v44  ;;  %v2712_v51 = vrot.slane %v2710_v57, 4  ;;  %v5084_v14 = vld [vmem:[%s5182_s8 + $0x18] ss:$8 sps:$4 sm:$0xff]   ;;  %v5090_v21 = vld [vmem:[%s5182_s8 + $0x4c] ss:$8 sps:$4 sm:$0xff]  }
  0xbc   : > { %638 = vmatmul.mubr.bf16.gmra.mrb[56].mxu0 %v3835_v61  ;;  %v2719_v61 = vshll.u32 %v5812_v54, 16  ;;  %v5095_v22 = vld [vmem:[%s5182_s8 + $0x60] ss:$8 sps:$4 sm:$0xff]  }
  0xbd   : > { %645 = vmatprep.mubr.bf16.mxu0 %v3838_v9  ;;  %v2703_v42 = vrot.slane %v2702_v39, 4  ;;  %v2747_v9 = vshrl.u32 %v5831_v52, 16  ;;  %v5968_v39 = vld [vmem:[%s5182_s8 + $0x138] sm:$0xff] }
  0xbe   : > { %3191 = vmatmul.mubr.bf16.gmra.mrb[76].mxu1 %v4166_v19  ;;  %v2675_v19 = vshrl.u32 %v5769_v24, 16  ;;  %v2721_v56 = vrot.slane %v2719_v61, 5 }
  0xbf   : > { %3198 = vmatprep.mubr.bf16.mxu1 %v4169_v5  ;;  %v2645_v5 = vrot.slane %v2644_v40, 4  ;;  %v2723_v40 = vshrl.u32 %v5812_v54, 16  ;;  %v4109_v54 = vld [vmem:[%s5182_s8 + $0x100] sm:$0x11] }
  0xc0   : > { %v2677_v18 = vrot.slane %v2675_v19, 4  ;;  %v2729_v25 = vshll.u32 %v4109_v54, 16  ;;  %v5971_v54 = vld [vmem:[%s5182_s8 + $0x140] sm:$0xff] }
  0xc1   : > { %v2650_v24 = vsel %vm5229_vm2, %v2645_v5, %v2649_v53  ;;  %v2725_v19 = vrot.slane %v2723_v40, 4  ;;  %v2693_v5 = vrot.slane %v2692_v1, 4 }
  0xc2   : > { %v2678_v2 = vor.u32 %v2677_v18, %v2673_v35  ;;  %v4173_v6 = vcombine.high %v2650_v24, %v2660_v45  ;;  %v4172_v31 = vcombine.low %v2650_v24, %v2660_v45  ;;  %v2743_v24 = vshll.u32 %v5831_v52, 16 }
  0xc3   : > { %v2726_v33 = vor.u32 %v2725_v19, %v2721_v56  ;;  %v2698_v35 = vsel %vm5229_vm2, %v2693_v5, %v2697_v44  ;;  %v2731_v23 = vrot.slane %v2729_v25, 5  ;;  %v2782_v19 = vshrl.u32 %v5968_v39, 16 }
  0xc4   : > { %v2679_v53 = vrot.slane %v2678_v2, 4  ;;  %646 = vmatmul.mubr.bf16.gmra.mrb[60].mxu0 %v3837_v36  ;;  %v2737_v36 = vshll.u32 %v5828_v10, 16  ;;  %v2736_v2 = vrot.slane %v2734_v20, 4  ;;  %v2745_v49 = vrot.slane %v2743_v24, 5 }
  0xc5   : > { %2316 = vmatprep.mubr.bf16.mxu0 %v5086_v48  ;;  %v2727_v60 = vrot.slane %v2726_v33, 4  ;;  %v2771_v48 = vshrl.u32 %v5954_v0, 16  ;;  %v2785_v5 = vshll.u32 %v5968_v39, 16 }
  0xc6   : > { %3199 = vmatmul.mubr.bf16.gmra.mrb[80].mxu1 %v4168_v7  ;;  %v4170_v7 = vcombine.low %v2626_v34, %v2636_v47  ;;  %v2684_v13 = vsel %vm5229_vm2, %v2679_v53, %v2683_v43  ;;  %v2715_v34 = vrot.slane %v2713_v17, 5  ;;  %v2739_v58 = vrot.slane %v2737_v36, 5  ;;  %v5089_v43 = vld [vmem:[%s5182_s8 + $0x30] ss:$8 sps:$4 sm:$0xff]  }
  0xc7   : > { %3206 = vmatprep.mubr.bf16.mxu1 %v4171_v11  ;;  %v4175_v47 = vcombine.high %v2674_v15, %v2684_v13  ;;  %v2707_v11 = vrot.slane %v2705_v12, 5  ;;  %v4174_v45 = vcombine.low %v2674_v15, %v2684_v13  ;;  %v2732_v53 = vsel %vm5229_vm2, %v2727_v60, %v2731_v23  ;;  %v4115_v13 = vld [vmem:[%s5182_s8 + $0x130] sm:$0x11] }
  0xc8   : > { %v2716_v41 = vor.u32 %v2715_v34, %v2712_v51  ;;  %v2740_v59 = vor.u32 %v2739_v58, %v2736_v2  ;;  %v2767_v17 = vshll.u32 %v5954_v0, 16  ;;  %v2755_v15 = vrot.slane %v2753_v28, 5  ;;  %v4118_v2 = vld [vmem:[%s5182_s8 + $0x148] sm:$0x11]  ;;  %v5988_v58 = vld [vmem:[%s5182_s8 + $0x158] sm:$0xff] }
  0xc9   : > { %v2708_v18 = vsel %vm5229_vm2, %v2703_v42, %v2707_v11  ;;  %v5093_v42 = vld [vmem:[%s5182_s8 + $0x64] ss:$8 sps:$4 sm:$0xff]   ;;  %v2777_v11 = vshll.u32 %v4115_v13, 16 }
  0xca   : > { %v2717_v30 = vrot.slane %v2716_v41, 4  ;;  %v4177_v10 = vcombine.high %v2698_v35, %v2708_v18  ;;  %v4176_v12 = vcombine.low %v2698_v35, %v2708_v18  ;;  %v2741_v40 = vrot.slane %v2740_v59, 4  ;;  %v6001_v13 = vld [vmem:[%s5182_s8 + $0x168] sm:$0xff] }
  0xcb   : > { %v2769_v34 = vrot.slane %v2767_v17, 5  ;;  %v2795_v41 = vshrl.u32 %v5971_v54, 16  ;;  %v2784_v35 = vrot.slane %v2782_v19, 4  ;;  %v2787_v18 = vrot.slane %v2785_v5, 5 }
  0xcc   : > { %2317 = vmatmul.mubr.bf16.vlgmr.msra.gmra.mrb[64].mxu0 %v5084_v14  ;;  %v2722_v52 = vsel %vm5229_vm2, %v2717_v30, %v2721_v56  ;;  %v5092_v56 = vld [vmem:[%s5182_s8 + $0x48] ss:$8 sps:$4 sm:$0xff]   ;;  %v2791_v14 = vshll.u32 %v5971_v54, 16  ;;  %v2746_v25 = vsel %vm5229_vm2, %v2741_v40, %v2745_v49  ;;  %v2779_v60 = vrot.slane %v2777_v11, 5 }
  0xcd   : > { %2324 = vmatprep.mubr.bf16.mxu0 %v5087_v16  ;;  %v4179_v61 = vcombine.high %v2722_v52, %v2732_v53  ;;  %v4178_v36 = vcombine.low %v2722_v52, %v2732_v53  ;;  %v5984_v30 = vld [vmem:[%s5182_s8 + $0x150] sm:$0xff]  ;;  %v5096_v52 = vld [vmem:[%s5182_s8 + $0x7c] ss:$8 sps:$4 sm:$0xff]   ;;  %v2801_v53 = vshll.u32 %v4118_v2, 16  ;;  %v2830_v5 = vshrl.u32 %v6001_v13, 16 }
  0xce   : > { %3207 = vmatmul.mubr.bf16.gmra.mrb[84].mxu1 %v4170_v7  ;;  %v2749_v7 = vrot.slane %v2747_v9, 4  ;;  %v2793_v9 = vrot.slane %v2791_v14, 5  ;;  %v2833_v14 = vshll.u32 %v6001_v13, 16 }
  0xcf   : > { %3214 = vmatprep.mubr.bf16.mxu1 %v4173_v6  ;;  %v5951_v6 = vld [vmem:[%s5182_s8 + $0x120] sm:$0xff] }
  0xd0   : > { %v2758_v44 = vshrl.u32 %v5951_v6, 16  ;;  %v2750_v26 = vor.u32 %v2749_v7, %v2745_v49  ;;  %v2761_v57 = vshll.u32 %v5951_v6, 16  ;;  %v2788_v49 = vor.u32 %v2787_v18, %v2784_v35 }
  0xd1   : > { %v2806_v7 = vshrl.u32 %v5984_v30, 16 }
  0xd2   : > { %v2760_v1 = vrot.slane %v2758_v44, 4  ;;  %v2763_v51 = vrot.slane %v2761_v57, 5  ;;  %v2815_v44 = vshll.u32 %v5988_v58, 16  ;;  %v2789_v17 = vrot.slane %v2788_v49, 4 }
  0xd4   : > { %2325 = vmatmul.mubr.bf16.gmra.mrb[68].mxu0 %v5089_v43  ;;  %v2764_v33 = vor.u32 %v2763_v51, %v2760_v1  ;;  %v2809_v43 = vshll.u32 %v5984_v30, 16  ;;  %v2817_v1 = vrot.slane %v2815_v44, 5  ;;  %v6004_v51 = vld [vmem:[%s5182_s8 + $0x170] sm:$0xff] }
  0xd5   : > { %2332 = vmatprep.mubr.bf16.mxu0 %v5090_v21 }
  0xd6   : > { %3215 = vmatmul.mubr.bf16.gmra.mrb[88].mxu1 %v4172_v31  ;;  %v2751_v31 = vrot.slane %v2750_v26, 4  ;;  %v2765_v23 = vrot.slane %v2764_v33, 4  ;;  %v2819_v26 = vshrl.u32 %v5988_v58, 16 }
  0xd7   : > { %3222 = vmatprep.mubr.bf16.mxu1 %v4175_v47  ;;  %v2773_v47 = vrot.slane %v2771_v48, 4  ;;  %v2808_v48 = vrot.slane %v2806_v7, 4 }
  0xd8   : > { %v2756_v16 = vsel %vm5229_vm2, %v2751_v31, %v2755_v15  ;;  %v2770_v59 = vsel %vm5229_vm2, %v2765_v23, %v2769_v34  ;;  %v2803_v15 = vrot.slane %v2801_v53, 5  ;;  %v2821_v31 = vrot.slane %v2819_v26, 4  ;;  %v6027_v53 = vld [vmem:[%s5182_s8 + $0x188] sm:$0xff] }
  0xd9   : > { %v2774_v20 = vor.u32 %v2773_v47, %v2769_v34  ;;  %v4181_v24 = vcombine.high %v2746_v25, %v2756_v16  ;;  %v4180_v57 = vcombine.low %v2746_v25, %v2756_v16  ;;  %v4121_v34 = vld [vmem:[%s5182_s8 + $0x160] sm:$0x11]  ;;  %v2843_v25 = vshrl.u32 %v6004_v51, 16 }
  0xda   : > { %v5098_v47 = vld [vmem:[%s5182_s8 + $0x78] ss:$8 sps:$4 sm:$0xff]   ;;  %v2822_v16 = vor.u32 %v2821_v31, %v2817_v1  ;;  %v2825_v33 = vshll.u32 %v4121_v34, 16 }
  0xdc   : > { %2333 = vmatmul.mubr.bf16.gmra.mrb[72].mxu0 %v5092_v56  ;;  %v6010_v56 = vsel %vm5229_vm2, %v2789_v17, %v2793_v9  ;;  %v2823_v7 = vrot.slane %v2822_v16, 4 }
  0xdd   : > { %2340 = vmatprep.mubr.bf16.mxu0 %v5093_v42  ;;  %v4043_v42 = vcombine.high %v5850_v29, %v5853_v32 }
  0xde   : > { %3223 = vmatmul.mubr.bf16.gmra.mrb[92].mxu1 %v4174_v45  ;;  %v2797_v45 = vrot.slane %v2795_v41, 4  ;;  %v2839_v41 = vshll.u32 %v6004_v51, 16 }
  0xdf   : > { %3230 = vmatprep.mubr.bf16.mxu1 %v4177_v10  ;;  %v2775_v10 = vrot.slane %v2774_v20, 4 }
  0xe0   : > { %v2798_v21 = vor.u32 %v2797_v45, %v2793_v9  ;;  %v2832_v9 = vrot.slane %v2830_v5, 4  ;;  %v2841_v2 = vrot.slane %v2839_v41, 5  ;;  %v4127_v5 = vld [vmem:[%s5182_s8 + $0x190] sm:$0x11] }
  0xe1   : > { %v2780_v28 = vsel %vm5229_vm2, %v2775_v10, %v2779_v60  ;;  %v4124_v10 = vld [vmem:[%s5182_s8 + $0x178] sm:$0x11]  ;;  %v2835_v60 = vrot.slane %v2833_v14, 5 }
  0xe2   : > { %v2799_v40 = vrot.slane %v2798_v21, 4  ;;  %v4182_v35 = vcombine.low %v2770_v59, %v2780_v28 }
  0xe3   : > { %v2836_v26 = vor.u32 %v2835_v60, %v2832_v9 }
  0xe4   : > { %2341 = vmatmul.mubr.bf16.gmra.mrb[76].mxu0 %v5095_v22  ;;  %v2804_v11 = vsel %vm5229_vm2, %v2799_v40, %v2803_v15  ;;  %v2845_v22 = vrot.slane %v2843_v25, 4 }
  0xe5   : > { %2348 = vmatprep.mubr.bf16.mxu0 %v5096_v52  ;;  %v4185_v18 = vcombine.high %v6010_v56, %v2804_v11  ;;  %v6023_v52 = vld [vmem:[%s5182_s8 + $0x180] sm:$0xff]  ;;  %v4184_v15 = vcombine.low %v6010_v56, %v2804_v11  ;;  %v2873_v56 = vshll.u32 %v4127_v5, 16 }
  0xe6   : > { %3231 = vmatmul.mubr.bf16.gmra.mrb[96].mxu1 %v4176_v12  ;;  %v2811_v12 = vrot.slane %v2809_v43, 5  ;;  %v2827_v43 = vrot.slane %v2825_v33, 5  ;;  %v2854_v17 = vshrl.u32 %v6023_v52, 16 }
  0xe7   : > { %3238 = vmatprep.mubr.bf16.mxu1 %v4179_v61  ;;  %v4183_v61 = vcombine.high %v2770_v59, %v2780_v28  ;;  %v4042_v59 = vcombine.low %v5850_v29, %v5853_v32  ;;  %v2849_v28 = vshll.u32 %v4124_v10, 16  ;;  %v2867_v29 = vshrl.u32 %v6027_v53, 16 }
  0xe8   : > { %v2812_v19 = vor.u32 %v2811_v12, %v2808_v48  ;;  %v2828_v48 = vsel %vm5229_vm2, %v2823_v7, %v2827_v43  ;;  %v2857_v12 = vshll.u32 %v6023_v52, 16 }
  0xe9   : > { %v2869_v33 = vrot.slane %v2867_v29, 4 }
  0xea   : > { %v2859_v25 = vrot.slane %v2857_v12, 5 }
  0xec   : > { %2349 = vmatmul.mubr.bf16.gmra.mrb[80].mxu0 %v5098_v47 }
  0xed   : > { %2356 = vmatprep.mubr.bf16.mxu0 %v4043_v42  ;;  %v2856_v42 = vrot.slane %v2854_v17, 4 }
  0xee   : > { %3239 = vmatmul.mubr.bf16.gmra.mrb[100].mxu1 %v4178_v36 }
  0xef   : > { %3246 = vmatprep.mubr.bf16.mxu1 %v4181_v24  ;;  %v2813_v24 = vrot.slane %v2812_v19, 4  ;;  %v2837_v19 = vrot.slane %v2836_v26, 4 }
  0xf1   : > { %v2818_v44 = vsel %vm5229_vm2, %v2813_v24, %v2817_v1  ;;  %v2851_v1 = vrot.slane %v2849_v28, 5 }
  0xf2   : > { %v4187_v47 = vcombine.high %v2818_v44, %v2828_v48  ;;  %v4186_v9 = vcombine.low %v2818_v44, %v2828_v48 }
  0xf4   : > { %2357 = vmatmul.mubr.bf16.gmra.mrb[84].mxu0 %v4042_v59 }
  0xf5   : > { %2364 = vmatprep.mubr.bf16.mxu0 %v5750_v62  ;;  %v2842_v62 = vsel %vm5229_vm2, %v2837_v19, %v2841_v2 }
  0xf6   : > { %3247 = vmatmul.mubr.bf16.gmra.mrb[104].mxu1 %v4180_v57  ;;  %v2846_v57 = vor.u32 %v2845_v22, %v2841_v2 }
  0xf7   : > { %3254 = vmatprep.mubr.bf16.mxu1 %v4183_v61  ;;  %v2863_v61 = vshll.u32 %v6027_v53, 16 }
  0xf8   : > { %v2847_v41 = vrot.slane %v2846_v57, 4 }
  0xf9   : > { %v4658_v20 = vpop.f32.mrb[0].mxu1  ;;  %v2865_v16 = vrot.slane %v2863_v61, 5 }
  0xfa   : > { %v4659_v36 = vpop.f32.mrb[1].mxu1  ;;  %v2852_v11 = vsel %vm5229_vm2, %v2847_v41, %v2851_v1  ;;  %v4054_v41 = vcombine.low %v5951_v6, %v5954_v0 }
  0xfb   : > { %v4660_v45 = vadd.f32 %v4659_v36, %v4658_v20  ;;  %v4661_v23 = vpop.f32.mrb[2].mxu1  ;;  %v2860_v36 = vor.u32 %v2859_v25, %v2856_v42  ;;  %v4189_v10 = vcombine.high %v2842_v62, %v2852_v11  ;;  %v4188_v59 = vcombine.low %v2842_v62, %v2852_v11 }
  0xfc   : > { %v4662_v49 = vpop.f32.mrb[3].mxu1  ;;  %2365 = vmatmul.mubr.bf16.gmra.mrb[88].mxu0 %v5778_v55 }
  0xfd   : > { %v4663_v21 = vadd.f32 %v4662_v49, %v4661_v23  ;;  %1539 = vrot.lane.b32.xlu0 %v4660_v45, %s5120_s25  ;;  %2372 = vmatprep.mubr.bf16.mxu0 %v5782_v38  ;;  %v2861_v22 = vrot.slane %v2860_v36, 4  ;;  %v2875_v49 = vrot.slane %v2873_v56, 5 }
  0xfe   : > { %3255 = vmatmul.mubr.bf16.gmra.mrb[108].mxu1 %v4182_v35  ;;  %v2870_v35 = vor.u32 %v2869_v33, %v2865_v16  ;;  %v4057_v33 = vcombine.high %v5968_v39, %v5971_v54 }
  0xff   : > { %3262 = vmatprep.mubr.bf16.mxu1 %v4185_v18  ;;  %v2866_v55 = vsel %vm5229_vm2, %v2861_v22, %v2865_v16 }
 0x100   : > { %v2871_v2 = vrot.slane %v2870_v35, 4 }
 0x101   : > { %v4664_v32 = vpop.f32.mrb[4].mxu1  ;;  %1541 = vrot.lane.b32.xlu0 %v4663_v21, %s5120_s25 }
 0x102   : > { %v4665_v40 = vpop.f32.mrb[5].mxu1  ;;  %v2876_v38 = vsel %vm5229_vm2, %v2871_v2, %v2875_v49 }
 0x103   : > { %v4666_v31 = vadd.f32 %v4665_v40, %v4664_v32  ;;  %v4667_v34 = vpop.f32.mrb[6].mxu1  ;;  %v4191_v26 = vcombine.high %v2866_v55, %v2876_v38 }
 0x104   : > { %v4668_v14 = vpop.f32.mrb[7].mxu1  ;;  %2373 = vmatmul.mubr.bf16.gmra.mrb[92].mxu0 %v5800_v3  ;;  %v4190_v3 = vcombine.low %v2866_v55, %v2876_v38 }
 0x105   : > { %v4669_v20 = vadd.f32 %v4668_v14, %v4667_v34  ;;  %1543 = vrot.lane.b32.xlu1 %v4666_v31, %s5120_s25  ;;  %2380 = vmatprep.mubr.bf16.mxu0 %v5804_v50 }
 0x106   : > { %3263 = vmatmul.mubr.bf16.gmra.mrb[112].mxu1 %v4184_v15 }
 0x107   : > { %3270 = vmatprep.mubr.bf16.mxu1 %v4187_v47 }
 0x109   : > { %v4670_v18 = vpop.f32.mrb[8].mxu1  ;;  %1545 = vrot.lane.b32.xlu1 %v4669_v20, %s5120_s25 }
 0x10a   : > { %v4671_v24 = vpop.f32.mrb[9].mxu1 }
 0x10b   : > { %v4672_v45 = vadd.f32 %v4671_v24, %v4670_v18  ;;  %v4673_v23 = vpop.f32.mrb[10].mxu1  ;;  %v4056_v24 = vcombine.low %v5968_v39, %v5971_v54 }
 0x10c   : > { %v4674_v60 = vpop.f32.mrb[11].mxu1  ;;  %2381 = vmatmul.mubr.bf16.gmra.mrb[96].mxu0 %v5816_v27 }
 0x10d   : > { %v4675_v7 = vadd.f32 %v4674_v60, %v4673_v23  ;;  %1547 = vrot.lane.b32.xlu0 %v4672_v45, %s5120_s25  ;;  %2388 = vmatprep.mubr.bf16.mxu0 %v5820_v46  ;;  %v4055_v46 = vcombine.high %v5951_v6, %v5954_v0  ;;  %v4059_v23 = vcombine.high %v5984_v30, %v5988_v58 }
 0x10e   : > { %3271 = vmatmul.mubr.bf16.gmra.mrb[116].mxu1 %v4186_v9 }
 0x10f   : > { %1549 = vrot.lane.b32.xlu1 %v4675_v7, %s5120_s25  ;;  %3278 = vmatprep.mubr.bf16.mxu1 %v4189_v10 }
 0x111   : > { %v4676_v43 = vpop.f32.mrb[12].mxu1 }
 0x112   : > { %v4677_v21 = vpop.f32.mrb[13].mxu1 }
 0x113   : > { %v4678_v28 = vadd.f32 %v4677_v21, %v4676_v43  ;;  %v4679_v44 = vpop.f32.mrb[14].mxu1  ;;  %v4058_v43 = vcombine.low %v5984_v30, %v5988_v58 }
 0x114   : > { %v4680_v57 = vpop.f32.mrb[15].mxu1  ;;  %2389 = vmatmul.mubr.bf16.gmra.mrb[100].mxu0 %v5835_v63 }
 0x115   : > { %v4681_v17 = vadd.f32 %v4680_v57, %v4679_v44  ;;  %1551 = vrot.lane.b32.xlu0 %v4678_v28, %s5120_s25  ;;  %2396 = vmatprep.mubr.bf16.mxu0 %v5842_v4  ;;  %v4061_v28 = vcombine.high %v6001_v13, %v6004_v51 }
 0x116   : > { %3279 = vmatmul.mubr.bf16.gmra.mrb[120].mxu1 %v4188_v59 }
 0x117   : > { %1553 = vrot.lane.b32.xlu1 %v4681_v17, %s5120_s25  ;;  %3286 = vmatprep.mubr.bf16.mxu1 %v4191_v26 }
 0x119   : > { %v4682_v37 = vpop.f32.mrb[16].mxu1 }
 0x11a   : > { %v4683_v48 = vpop.f32.mrb[17].mxu1 }
 0x11b   : > { %v4684_v12 = vadd.f32 %v4683_v48, %v4682_v37  ;;  %v4685_v50 = vpop.f32.mrb[18].mxu1 }
 0x11c   : > { %v4686_v61 = vpop.f32.mrb[19].mxu1  ;;  %2397 = vmatmul.mubr.bf16.gmra.mrb[104].mxu0 %v5857_v8 }
 0x11d   : > { %v4687_v29 = vadd.f32 %v4686_v61, %v4685_v50  ;;  %1555 = vrot.lane.b32.xlu0 %v4684_v12, %s5120_s25  ;;  %2404 = vmatprep.mubr.bf16.mxu0 %v4055_v46  ;;  %v4060_v50 = vcombine.low %v6001_v13, %v6004_v51 }
 0x11e   : > { %3287 = vmatmul.mubr.bf16.gmra.mrb[124].mxu1 %v4190_v3 }
 0x11f   : > { %1557 = vrot.lane.b32.xlu1 %v4687_v29, %s5120_s25  ;;  %v4546_v4 = vpop.f32.mrb[0].mxu0 }
 0x120   : > { %v4547_v14 = vpop.f32.mrb[1].mxu0 }
 0x121   : > { %v4688_v32 = vpop.f32.mrb[20].mxu1  ;;  %v6075_v25 = vadd.f32 %v4547_v14, %v4546_v4  ;;  %v4549_v16 = vpop.f32.mrb[2].mxu0 }
 0x122   : > { %v4689_v40 = vpop.f32.mrb[21].mxu1  ;;  %v4550_v8 = vpop.f32.mrb[3].mxu0 }
 0x123   : > { %v4690_v27 = vadd.f32 %v4689_v40, %v4688_v32  ;;  %v4691_v15 = vpop.f32.mrb[22].mxu1  ;;  %v6080_v20 = vadd.f32 %v4550_v8, %v4549_v16  ;;  %v4063_v32 = vcombine.high %v6023_v52, %v6027_v53 }
 0x124   : > { %v4692_v1 = vpop.f32.mrb[23].mxu1  ;;  %2405 = vmatmul.mubr.bf16.gmra.mrb[108].mxu0 %v4054_v41 }
 0x125   : > { %v4693_v31 = vadd.f32 %v4692_v1, %v4691_v15  ;;  %1559 = vrot.lane.b32.xlu0 %v4690_v27, %s5120_s25  ;;  %2412 = vmatprep.mubr.bf16.mxu0 %v4057_v33 }
 0x127   : > { %1561 = vrot.lane.b32.xlu1 %v4693_v31, %s5120_s25  ;;  %v4552_v18 = vpop.f32.mrb[4].mxu0 }
 0x128   : > { %v4553_v0 = vpop.f32.mrb[5].mxu0 }
 0x129   : > { %v4694_v34 = vpop.f32.mrb[24].mxu1  ;;  %v6085_v9 = vadd.f32 %v4553_v0, %v4552_v18  ;;  %v4555_v45 = vpop.f32.mrb[6].mxu0 }
 0x12a   : > { %v4695_v47 = vpop.f32.mrb[25].mxu1  ;;  %v4556_v10 = vpop.f32.mrb[7].mxu0 }
 0x12b   : > { %v4696_v63 = vadd.f32 %v4695_v47, %v4694_v34  ;;  %v4697_v19 = vpop.f32.mrb[26].mxu1  ;;  %v6090_v60 = vadd.f32 %v4556_v10, %v4555_v45 }
 0x12c   : > { %v4698_v5 = vpop.f32.mrb[27].mxu1  ;;  %2413 = vmatmul.mubr.bf16.gmra.mrb[112].mxu0 %v4056_v24 }
 0x12d   : > { %v4699_v42 = vadd.f32 %v4698_v5, %v4697_v19  ;;  %1563 = vrot.lane.b32.xlu0 %v4696_v63, %s5120_s25  ;;  %2420 = vmatprep.mubr.bf16.mxu0 %v4059_v23  ;;  %v4062_v63 = vcombine.low %v6023_v52, %v6027_v53 }
 0x12f   : > { %1565 = vrot.lane.b32.xlu1 %v4699_v42, %s5120_s25  ;;  %v4558_v38 = vpop.f32.mrb[8].mxu0 }
 0x130   : > { %v4559_v54 = vpop.f32.mrb[9].mxu0 }
 0x131   : > { %v4700_v56 = vpop.f32.mrb[28].mxu1  ;;  %v6095_v21 = vadd.f32 %v4559_v54, %v4558_v38  ;;  %v4561_v59 = vpop.f32.mrb[10].mxu0 }
 0x132   : > { %v4701_v62 = vpop.f32.mrb[29].mxu1  ;;  %v4562_v44 = vpop.f32.mrb[11].mxu0 }
 0x133   : > { %v4702_v11 = vadd.f32 %v4701_v62, %v4700_v56  ;;  %v4703_v36 = vpop.f32.mrb[30].mxu1  ;;  %v6100_v26 = vadd.f32 %v4562_v44, %v4561_v59 }
 0x134   : > { %v4704_v35 = vpop.f32.mrb[31].mxu1  ;;  %2421 = vmatmul.mubr.bf16.gmra.mrb[116].mxu0 %v4058_v43 }
 0x135   : > { %v4705_v6 = vadd.f32 %v4704_v35, %v4703_v36  ;;  %1567 = vrot.lane.b32.xlu0 %v4702_v11, %s5120_s25  ;;  %2428 = vmatprep.mubr.bf16.mxu0 %v4061_v28 }
 0x137   : > { %1569 = vrot.lane.b32.xlu1 %v4705_v6, %s5120_s25  ;;  %v4564_v12 = vpop.f32.mrb[12].mxu0 }
 0x138   : > { %v4565_v58 = vpop.f32.mrb[13].mxu0 }
 0x139   : > { %v4706_v22 = vpop.f32.mrb[32].mxu1  ;;  %v6105_v61 = vadd.f32 %v4565_v58, %v4564_v12  ;;  %v4567_v29 = vpop.f32.mrb[14].mxu0 }
 0x13a   : > { %v4707_v2 = vpop.f32.mrb[33].mxu1  ;;  %v4568_v40 = vpop.f32.mrb[15].mxu0 }
 0x13b   : > { %v4708_v49 = vadd.f32 %v4707_v2, %v4706_v22  ;;  %v4709_v7 = vpop.f32.mrb[34].mxu1  ;;  %v6110_v27 = vadd.f32 %v4568_v40, %v4567_v29 }
 0x13c   : > { %v4710_v55 = vpop.f32.mrb[35].mxu1  ;;  %2429 = vmatmul.mubr.bf16.gmra.mrb[120].mxu0 %v4060_v50 }
 0x13d   : > { %v4711_v39 = vadd.f32 %v4710_v55, %v4709_v7  ;;  %1571 = vrot.lane.b32.xlu0 %v4708_v49, %s5120_s25  ;;  %2436 = vmatprep.mubr.bf16.mxu0 %v4063_v32 }
 0x13f   : > { %1573 = vrot.lane.b32.xlu1 %v4711_v39, %s5120_s25  ;;  %v4570_v47 = vpop.f32.mrb[16].mxu0 }
 0x140   : > { %v4571_v51 = vpop.f32.mrb[17].mxu0 }
 0x141   : > { %v4712_v57 = vpop.f32.mrb[36].mxu1  ;;  %v6115_v19 = vadd.f32 %v4571_v51, %v4570_v47  ;;  %v4573_v5 = vpop.f32.mrb[18].mxu0 }
 0x142   : > { %v4713_v17 = vpop.f32.mrb[37].mxu1  ;;  %v4574_v4 = vpop.f32.mrb[19].mxu0 }
 0x143   : > { %v4714_v37 = vadd.f32 %v4713_v17, %v4712_v57  ;;  %v4715_v48 = vpop.f32.mrb[38].mxu1  ;;  %v6118_v42 = vadd.f32 %v4574_v4, %v4573_v5 }
 0x144   : > { %v4716_v3 = vpop.f32.mrb[39].mxu1  ;;  %2437 = vmatmul.mubr.bf16.gmra.mrb[124].mxu0 %v4062_v63 }
 0x145   : > { %v4717_v30 = vadd.f32 %v4716_v3, %v4715_v48  ;;  %1575 = vrot.lane.b32.xlu0 %v4714_v37, %s5120_s25 }
 0x147   : > { %1577 = vrot.lane.b32.xlu1 %v4717_v30, %s5120_s25  ;;  %v4576_v56 = vpop.f32.mrb[20].mxu0 }
 0x148   : > { %v4577_v11 = vpop.f32.mrb[21].mxu0 }
 0x149   : > { %v4718_v15 = vpop.f32.mrb[40].mxu1  ;;  %v6121_v52 = vadd.f32 %v4577_v11, %v4576_v56  ;;  %v4579_v53 = vpop.f32.mrb[22].mxu0 }
 0x14a   : > { %v4719_v1 = vpop.f32.mrb[41].mxu1  ;;  %v4580_v36 = vpop.f32.mrb[23].mxu0 }
 0x14b   : > { %v4720_v31 = vadd.f32 %v4719_v1, %v4718_v15  ;;  %v4721_v46 = vpop.f32.mrb[42].mxu1  ;;  %v6124_v35 = vadd.f32 %v4580_v36, %v4579_v53  ;;  %v6142_v1 = vld [vmem:[%s6515_s2] ss:$0 sm:$0xff] }
 0x14c   : > { %v4722_v34 = vpop.f32.mrb[43].mxu1 }
 0x14d   : > { %v4723_v13 = vadd.f32 %v4722_v34, %v4721_v46  ;;  %1579 = vrot.lane.b32.xlu0 %v4720_v31, %s5120_s25 }
 0x14f   : > { %1581 = vrot.lane.b32.xlu1 %v4723_v13, %s5120_s25  ;;  %v4582_v23 = vpop.f32.mrb[24].mxu0 }
 0x150   : > { %v4583_v22 = vpop.f32.mrb[25].mxu0 }
 0x151   : > { %v4724_v14 = vpop.f32.mrb[44].mxu1  ;;  %v6127_v2 = vadd.f32 %v4583_v22, %v4582_v23  ;;  %v4585_v49 = vpop.f32.mrb[26].mxu0 }
 0x152   : > { %v4725_v41 = vpop.f32.mrb[45].mxu1  ;;  %v4586_v7 = vpop.f32.mrb[27].mxu0 }
 0x153   : > { %v4726_v16 = vadd.f32 %v4725_v41, %v4724_v14  ;;  %v4727_v33 = vpop.f32.mrb[46].mxu1  ;;  %v6130_v55 = vadd.f32 %v4586_v7, %v4585_v49 }
 0x154   : > { %v4728_v8 = vpop.f32.mrb[47].mxu1 }
 0x155   : > { %v4729_v62 = vadd.f32 %v4728_v8, %v4727_v33  ;;  %1583 = vrot.lane.b32.xlu0 %v4726_v16, %s5120_s25 }
 0x157   : > { %1585 = vrot.lane.b32.xlu1 %v4729_v62, %s5120_s25  ;;  %v4588_v28 = vpop.f32.mrb[28].mxu0 }
 0x158   : > { %v4589_v57 = vpop.f32.mrb[29].mxu0 }
 0x159   : > { %v4730_v18 = vpop.f32.mrb[48].mxu1  ;;  %v6133_v17 = vadd.f32 %v4589_v57, %v4588_v28  ;;  %v4591_v37 = vpop.f32.mrb[30].mxu0 }
 0x15a   : > { %v4731_v6 = vpop.f32.mrb[49].mxu1  ;;  %v4592_v48 = vpop.f32.mrb[31].mxu0 }
 0x15b   : > { %v4732_v0 = vadd.f32 %v4731_v6, %v4730_v18  ;;  %v4733_v24 = vpop.f32.mrb[50].mxu1  ;;  %v6136_v3 = vadd.f32 %v4592_v48, %v4591_v37 }
 0x15c   : > { %v4734_v45 = vpop.f32.mrb[51].mxu1 }
 0x15d   : > { %v4735_v10 = vadd.f32 %v4734_v45, %v4733_v24  ;;  %1587 = vrot.lane.b32.xlu0 %v4732_v0, %s5120_s25 }
 0x15f   : > { %1589 = vrot.lane.b32.xlu1 %v4735_v10, %s5120_s25  ;;  %v4594_v32 = vpop.f32.mrb[32].mxu0 }
 0x160   : > { %v4595_v15 = vpop.f32.mrb[33].mxu0 }
 0x161   : > { %v4736_v38 = vpop.f32.mrb[52].mxu1  ;;  %v6144_v31 = vadd.f32 %v4595_v15, %v4594_v32  ;;  %v4597_v46 = vpop.f32.mrb[34].mxu0 }
 0x162   : > { %v4737_v39 = vpop.f32.mrb[53].mxu1  ;;  %v4598_v47 = vpop.f32.mrb[35].mxu0 }
 0x163   : > { %v4738_v54 = vadd.f32 %v4737_v39, %v4736_v38  ;;  %v4739_v43 = vpop.f32.mrb[54].mxu1  ;;  %v6149_v51 = vadd.f32 %v4598_v47, %v4597_v46 }
 0x164   : > { %v4740_v59 = vpop.f32.mrb[55].mxu1 }
 0x165   : > { %v4741_v44 = vadd.f32 %v4740_v59, %v4739_v43  ;;  %1591 = vrot.lane.b32.xlu0 %v4738_v54, %s5120_s25 }
 0x167   : > { %1593 = vrot.lane.b32.xlu1 %v4741_v44, %s5120_s25  ;;  %v4600_v56 = vpop.f32.mrb[36].mxu0 }
 0x169   : > { %v4742_v12 = vpop.f32.mrb[56].mxu1 }
 0x16a   : > { %v4743_v30 = vpop.f32.mrb[57].mxu1 }
 0x16b   : > { %v4744_v58 = vadd.f32 %v4743_v30, %v4742_v12  ;;  %v4745_v50 = vpop.f32.mrb[58].mxu1 }
 0x16c   : > { %v4746_v29 = vpop.f32.mrb[59].mxu1 }
 0x16d   : > { %v4747_v40 = vadd.f32 %v4746_v29, %v4745_v50  ;;  %1595 = vrot.lane.b32.xlu0 %v4744_v58, %s5120_s25 }
 0x16f   : > { %1597 = vrot.lane.b32.xlu1 %v4747_v40, %s5120_s25  ;;  %v1540_v34 = vpop.permute.xlu0 %1539 }
 0x170   : > { %v1636_v13 = vsel %vm1635_vm3, %v6075_v25, %v1540_v34  ;;  %v4601_v25 = vpop.f32.mrb[37].mxu0 }
 0x171   : > { %v1674_v63 = vadd.f32 %v6142_v1, %v1636_v13  ;;  %v4748_v5 = vpop.f32.mrb[60].mxu1  ;;  %v6157_v36 = vadd.f32 %v4601_v25, %v4600_v56  ;;  %v4603_v18 = vpop.f32.mrb[38].mxu0 }
 0x172   : > { %v4749_v4 = vpop.f32.mrb[61].mxu1 }
 0x173   : > { %v4750_v14 = vadd.f32 %v4749_v4, %v4748_v5  ;;  %v4751_v41 = vpop.f32.mrb[62].mxu1  ;;  %v1542_v16 = vpop.permute.xlu0 %1541  ;;  %v1738_v62 = vmul.f32 0.2, %v1674_v63  ;;  %vm1706_vm4 = vcmp.gt.f32.partialorder %v1674_v63, 0.0 }
 0x174   : > { %v1637_v33 = vsel %vm1635_vm3, %v6080_v20, %v1542_v16  ;;  %v4752_v8 = vpop.f32.mrb[63].mxu1  ;;  %v4604_v20 = vpop.f32.mrb[39].mxu0 }
 0x175   : > { %v1675_v11 = vadd.f32 %v6142_v1, %v1637_v33  ;;  %v4753_v53 = vadd.f32 %v4752_v8, %v4751_v41  ;;  %1599 = vrot.lane.b32.xlu0 %v4750_v14, %s5120_s25  ;;  %v6162_v45 = vadd.f32 %v4604_v20, %v4603_v18  ;;  %v1770_v23 = vsel %vm1706_vm4, %v1674_v63, %v1738_v62  ;;  %v4606_v28 = vpop.f32.mrb[40].mxu0 }
 0x176   : > { %v4607_v48 = vpop.f32.mrb[41].mxu0 }
 0x177   : > { %vm1707_vm5 = vcmp.gt.f32.partialorder %v1675_v11, 0.0  ;;  %v1739_v6 = vmul.f32 0.2, %v1675_v11  ;;  %1601 = vrot.lane.b32.xlu1 %v4753_v53, %s5120_s25  ;;  %v1544_v0 = vpop.permute.xlu1 %1543  ;;  %v6175_v12 = vadd.f32 %v4607_v48, %v4606_v28  ;;  %v4609_v30 = vpop.f32.mrb[42].mxu0 }
 0x178   : > { %v1638_v24 = vsel %vm1635_vm3, %v6085_v9, %v1544_v0 }
 0x179   : > { %v1771_v10 = vsel %vm1707_vm5, %v1675_v11, %v1739_v6  ;;  %v1676_v22 = vadd.f32 %v6142_v1, %v1638_v24  ;;  %v4882_v49 = vpop.f32.mrb[64].mxu1 }
 0x17a   : > { %v4342_v7 = vpack.c.bf16 %v1771_v10, %v1770_v23  ;;  %v4883_v38 = vpop.f32.mrb[65].mxu1 }
 0x17b   : > { %v4884_v39 = vadd.f32 %v4883_v38, %v4882_v49  ;;  %v4885_v54 = vpop.f32.mrb[66].mxu1  ;;  %v1546_v43 = vpop.permute.xlu1 %1545  ;;  %v1740_v44 = vmul.f32 0.2, %v1676_v22  ;;  %vm1708_vm6 = vcmp.gt.f32.partialorder %v1676_v22, 0.0 }
 0x17c   : > { %4343 = vst [vmem:[%s6167_s30] sm:$0xff] %v4342_v7   ;;  %v1639_v9 = vsel %vm1635_vm3, %v6090_v60, %v1546_v43  ;;  %v4886_v59 = vpop.f32.mrb[67].mxu1  ;;  %v4610_v60 = vpop.f32.mrb[43].mxu0 }
 0x17d   : > { %v1677_v57 = vadd.f32 %v6142_v1, %v1639_v9  ;;  %v4887_v37 = vadd.f32 %v4886_v59, %v4885_v54  ;;  %3327 = vrot.lane.b32.xlu0 %v4884_v39, %s5120_s25  ;;  %v6180_v32 = vadd.f32 %v4610_v60, %v4609_v30  ;;  %v1772_v40 = vsel %vm1708_vm6, %v1676_v22, %v1740_v44  ;;  %v4612_v33 = vpop.f32.mrb[44].mxu0 }
 0x17e   : > { %v4613_v62 = vpop.f32.mrb[45].mxu0 }
 0x17f   : > { %vm1709_vm7 = vcmp.gt.f32.partialorder %v1677_v57, 0.0  ;;  %v1741_v58 = vmul.f32 0.2, %v1677_v57  ;;  %3329 = vrot.lane.b32.xlu1 %v4887_v37, %s5120_s25  ;;  %v1548_v50 = vpop.permute.xlu0 %1547  ;;  %v6188_v11 = vadd.f32 %v4613_v62, %v4612_v33 }
 0x180   : > { %v1640_v29 = vsel %vm1635_vm3, %v6095_v21, %v1548_v50 }
 0x181   : > { %v1773_v15 = vsel %vm1709_vm7, %v1677_v57, %v1741_v58  ;;  %v1678_v46 = vadd.f32 %v6142_v1, %v1640_v29  ;;  %v4888_v34 = vpop.f32.mrb[68].mxu1  ;;  %v1550_v47 = vpop.permute.xlu1 %1549 }
 0x182   : > { %v4347_v13 = vpack.c.bf16 %v1773_v15, %v1772_v40  ;;  %v1641_v63 = vsel %vm1635_vm3, %v6100_v26, %v1550_v47  ;;  %v4889_v5 = vpop.f32.mrb[69].mxu1  ;;  %v4615_v26 = vpop.f32.mrb[46].mxu0 }
 0x183   : > { %v1742_v4 = vmul.f32 0.2, %v1678_v46  ;;  %v1679_v14 = vadd.f32 %v6142_v1, %v1641_v63  ;;  %v4890_v41 = vadd.f32 %v4889_v5, %v4888_v34  ;;  %v4891_v16 = vpop.f32.mrb[70].mxu1  ;;  %vm1710_vm8 = vcmp.gt.f32.partialorder %v1678_v46, 0.0  ;;  %v4616_v6 = vpop.f32.mrb[47].mxu0 }
 0x184   : > { %4499 = vst [vmem:[%s6167_s30 + $0x10] sm:$0xff] %v4347_v13   ;;  %v4892_v21 = vpop.f32.mrb[71].mxu1  ;;  %v6193_v24 = vadd.f32 %v4616_v6, %v4615_v26  ;;  %v4618_v59 = vpop.f32.mrb[48].mxu0 }
 0x185   : > { %vm1711_vm9 = vcmp.gt.f32.partialorder %v1679_v14, 0.0  ;;  %v1743_v8 = vmul.f32 0.2, %v1679_v14  ;;  %v4893_v56 = vadd.f32 %v4892_v21, %v4891_v16  ;;  %3331 = vrot.lane.b32.xlu0 %v4890_v41, %s5120_s25  ;;  %v1774_v53 = vsel %vm1710_vm8, %v1678_v46, %v1742_v4  ;;  %v4619_v44 = vpop.f32.mrb[49].mxu0 }
 0x186   : > { %v6201_v57 = vadd.f32 %v4619_v44, %v4618_v59  ;;  %v4621_v37 = vpop.f32.mrb[50].mxu0 }
 0x187   : > { %v1775_v25 = vsel %vm1711_vm9, %v1679_v14, %v1743_v8  ;;  %3333 = vrot.lane.b32.xlu1 %v4893_v56, %s5120_s25  ;;  %v1552_v18 = vpop.permute.xlu0 %1551  ;;  %v4622_v58 = vpop.f32.mrb[51].mxu0 }
 0x188   : > { %v4352_v0 = vpack.c.bf16 %v1775_v25, %v1774_v53  ;;  %v1642_v20 = vsel %vm1635_vm3, %v6105_v61, %v1552_v18  ;;  %v6206_v29 = vadd.f32 %v4622_v58, %v4621_v37  ;;  %v4624_v41 = vpop.f32.mrb[52].mxu0 }
 0x189   : > { %v1680_v23 = vadd.f32 %v6142_v1, %v1642_v20  ;;  %v4894_v10 = vpop.f32.mrb[72].mxu1  ;;  %v1554_v22 = vpop.permute.xlu1 %1553 }
 0x18a   : > { %4500 = vst [vmem:[%s6167_s30 + $0x20] sm:$0xff] %v4352_v0   ;;  %v1643_v49 = vsel %vm1635_vm3, %v6110_v27, %v1554_v22  ;;  %v4895_v7 = vpop.f32.mrb[73].mxu1  ;;  %v4625_v21 = vpop.f32.mrb[53].mxu0 }
 0x18b   : > { %v1744_v38 = vmul.f32 0.2, %v1680_v23  ;;  %v1681_v39 = vadd.f32 %v6142_v1, %v1643_v49  ;;  %v4896_v54 = vadd.f32 %v4895_v7, %v4894_v10  ;;  %v4897_v43 = vpop.f32.mrb[74].mxu1  ;;  %vm1712_vm10 = vcmp.gt.f32.partialorder %v1680_v23, 0.0  ;;  %v4627_v8 = vpop.f32.mrb[54].mxu0 }
 0x18c   : > { %v4898_v9 = vpop.f32.mrb[75].mxu1  ;;  %v6214_v33 = vadd.f32 %v4625_v21, %v4624_v41  ;;  %v4628_v26 = vpop.f32.mrb[55].mxu0 }
 0x18d   : > { %vm1713_vm11 = vcmp.gt.f32.partialorder %v1681_v39, 0.0  ;;  %v1745_v61 = vmul.f32 0.2, %v1681_v39  ;;  %v4899_v28 = vadd.f32 %v4898_v9, %v4897_v43  ;;  %3335 = vrot.lane.b32.xlu0 %v4896_v54, %s5120_s25  ;;  %v1776_v27 = vsel %vm1712_vm10, %v1680_v23, %v1744_v38 }
 0x18e   : > { %v6219_v18 = vadd.f32 %v4628_v26, %v4627_v8 }
 0x18f   : > { %v1777_v48 = vsel %vm1713_vm11, %v1681_v39, %v1745_v61  ;;  %3337 = vrot.lane.b32.xlu1 %v4899_v28, %s5120_s25  ;;  %v1556_v30 = vpop.permute.xlu0 %1555  ;;  %v4630_v54 = vpop.f32.mrb[56].mxu0 }
 0x190   : > { %v4357_v50 = vpack.c.bf16 %v1777_v48, %v1776_v27  ;;  %v1644_v60 = vsel %vm1635_vm3, %v6115_v19, %v1556_v30  ;;  %v4631_v9 = vpop.f32.mrb[57].mxu0 }
 0x191   : > { %v1682_v40 = vadd.f32 %v6142_v1, %v1644_v60  ;;  %v4900_v15 = vpop.f32.mrb[76].mxu1  ;;  %v1558_v46 = vpop.permute.xlu1 %1557  ;;  %v6227_v59 = vadd.f32 %v4631_v9, %v4630_v54 }
 0x192   : > { %4501 = vst [vmem:[%s6167_s30 + $0x30] sm:$0xff] %v4357_v50   ;;  %v1645_v34 = vsel %vm1635_vm3, %v6118_v42, %v1558_v46  ;;  %v4901_v47 = vpop.f32.mrb[77].mxu1  ;;  %v4633_v61 = vpop.f32.mrb[58].mxu0 }
 0x193   : > { %v1746_v13 = vmul.f32 0.2, %v1682_v40  ;;  %v1683_v63 = vadd.f32 %v6142_v1, %v1645_v34  ;;  %v4902_v5 = vadd.f32 %v4901_v47, %v4900_v15  ;;  %v4903_v4 = vpop.f32.mrb[78].mxu1  ;;  %vm1714_vm12 = vcmp.gt.f32.partialorder %v1682_v40, 0.0  ;;  %v4634_v37 = vpop.f32.mrb[59].mxu0 }
 0x194   : > { %v4904_v14 = vpop.f32.mrb[79].mxu1  ;;  %v6232_v30 = vadd.f32 %v4634_v37, %v4633_v61 }
 0x195   : > { %vm1715_vm13 = vcmp.gt.f32.partialorder %v1683_v63, 0.0  ;;  %v1747_v19 = vmul.f32 0.2, %v1683_v63  ;;  %v4905_v16 = vadd.f32 %v4904_v14, %v4903_v4  ;;  %3339 = vrot.lane.b32.xlu0 %v4902_v5, %s5120_s25  ;;  %v1778_v42 = vsel %vm1714_vm12, %v1682_v40, %v1746_v13 }
 0x197   : > { %v1779_v56 = vsel %vm1715_vm13, %v1683_v63, %v1747_v19  ;;  %3341 = vrot.lane.b32.xlu1 %v4905_v16, %s5120_s25  ;;  %v1560_v62 = vpop.permute.xlu0 %1559  ;;  %v4636_v5 = vpop.f32.mrb[60].mxu0 }
 0x198   : > { %v4362_v53 = vpack.c.bf16 %v1779_v56, %v1778_v42  ;;  %v1646_v25 = vsel %vm1635_vm3, %v6121_v52, %v1560_v62  ;;  %v4637_v14 = vpop.f32.mrb[61].mxu0 }
 0x199   : > { %v1684_v6 = vadd.f32 %v6142_v1, %v1646_v25  ;;  %v4906_v0 = vpop.f32.mrb[80].mxu1  ;;  %v1562_v20 = vpop.permute.xlu1 %1561  ;;  %v6240_v41 = vadd.f32 %v4637_v14, %v4636_v5 }
 0x19a   : > { %4502 = vst [vmem:[%s6167_s30 + $0x40] sm:$0xff] %v4362_v53   ;;  %v1647_v23 = vsel %vm1635_vm3, %v6124_v35, %v1562_v20  ;;  %v4907_v10 = vpop.f32.mrb[81].mxu1  ;;  %v4639_v19 = vpop.f32.mrb[62].mxu0 }
 0x19b   : > { %v1748_v22 = vmul.f32 0.2, %v1684_v6  ;;  %v1685_v49 = vadd.f32 %v6142_v1, %v1647_v23  ;;  %v4908_v7 = vadd.f32 %v4907_v10, %v4906_v0  ;;  %v4909_v38 = vpop.f32.mrb[82].mxu1  ;;  %vm1716_vm14 = vcmp.gt.f32.partialorder %v1684_v6, 0.0  ;;  %v4640_v8 = vpop.f32.mrb[63].mxu0 }
 0x19c   : > { %v4910_v39 = vpop.f32.mrb[83].mxu1  ;;  %v6245_v62 = vadd.f32 %v4640_v8, %v4639_v19 }
 0x19d   : > { %vm1717_vm15 = vcmp.gt.f32.partialorder %v1685_v49, 0.0  ;;  %v1749_v52 = vmul.f32 0.2, %v1685_v49  ;;  %v4911_v43 = vadd.f32 %v4910_v39, %v4909_v38  ;;  %3343 = vrot.lane.b32.xlu0 %v4908_v7, %s5120_s25  ;;  %v1780_v35 = vsel %vm1716_vm14, %v1684_v6, %v1748_v22 }
 0x19f   : > { %v1781_v28 = vsel %vm1717_vm15, %v1685_v49, %v1749_v52  ;;  %3345 = vrot.lane.b32.xlu1 %v4911_v43, %s5120_s25  ;;  %v1564_v44 = vpop.permute.xlu0 %1563  ;;  %v4770_v7 = vpop.f32.mrb[64].mxu0 }
 0x1a0   : > { %v4367_v27 = vpack.c.bf16 %v1781_v28, %v1780_v35  ;;  %v1648_v48 = vsel %vm1635_vm3, %v6127_v2, %v1564_v44  ;;  %v4771_v39 = vpop.f32.mrb[65].mxu0 }
 0x1a1   : > { %v1686_v58 = vadd.f32 %v6142_v1, %v1648_v48  ;;  %v4912_v50 = vpop.f32.mrb[84].mxu1  ;;  %v1566_v60 = vpop.permute.xlu1 %1565  ;;  %v6253_v54 = vadd.f32 %v4771_v39, %v4770_v7 }
 0x1a2   : > { %4503 = vst [vmem:[%s6167_s30 + $0x50] sm:$0xff] %v4367_v27   ;;  %v1649_v40 = vsel %vm1635_vm3, %v6130_v55, %v1566_v60  ;;  %v4913_v15 = vpop.f32.mrb[85].mxu1  ;;  %v4773_v52 = vpop.f32.mrb[66].mxu0 }
 0x1a3   : > { %v1750_v46 = vmul.f32 0.2, %v1686_v58  ;;  %v1687_v34 = vadd.f32 %v6142_v1, %v1649_v40  ;;  %v4914_v47 = vadd.f32 %v4913_v15, %v4912_v50  ;;  %v4915_v13 = vpop.f32.mrb[86].mxu1  ;;  %vm1718_vm0 = vcmp.gt.f32.partialorder %v1686_v58, 0.0  ;;  %v4774_v61 = vpop.f32.mrb[67].mxu0 }
 0x1a4   : > { %v4916_v63 = vpop.f32.mrb[87].mxu1  ;;  %v6258_v44 = vadd.f32 %v4774_v61, %v4773_v52 }
 0x1a5   : > { %vm1719_vm1 = vcmp.gt.f32.partialorder %v1687_v34, 0.0  ;;  %v1751_v2 = vmul.f32 0.2, %v1687_v34  ;;  %v4917_v4 = vadd.f32 %v4916_v63, %v4915_v13  ;;  %3347 = vrot.lane.b32.xlu0 %v4914_v47, %s5120_s25  ;;  %v1782_v55 = vsel %vm1718_vm0, %v1686_v58, %v1750_v46 }
 0x1a7   : > { %v1783_v16 = vsel %vm1719_vm1, %v1687_v34, %v1751_v2  ;;  %3349 = vrot.lane.b32.xlu1 %v4917_v4, %s5120_s25  ;;  %v1568_v21 = vpop.permute.xlu0 %1567  ;;  %v4776_v47 = vpop.f32.mrb[68].mxu0 }
 0x1a8   : > { %v4372_v42 = vpack.c.bf16 %v1783_v16, %v1782_v55  ;;  %v1650_v56 = vsel %vm1635_vm3, %v6133_v17, %v1568_v21  ;;  %v4777_v63 = vpop.f32.mrb[69].mxu0 }
 0x1a9   : > { %v1688_v26 = vadd.f32 %v6142_v1, %v1650_v56  ;;  %v4918_v53 = vpop.f32.mrb[88].mxu1  ;;  %v1570_v25 = vpop.permute.xlu1 %1569  ;;  %v6266_v5 = vadd.f32 %v4777_v63, %v4776_v47 }
 0x1aa   : > { %4504 = vst [vmem:[%s6167_s30 + $0x60] sm:$0xff] %v4372_v42   ;;  %v1651_v6 = vsel %vm1635_vm3, %v6136_v3, %v1570_v25  ;;  %v4919_v0 = vpop.f32.mrb[89].mxu1  ;;  %v4779_v2 = vpop.f32.mrb[70].mxu0 }
 0x1ab   : > { %v1752_v20 = vmul.f32 0.2, %v1688_v26  ;;  %v1689_v23 = vadd.f32 %v6142_v1, %v1651_v6  ;;  %v4920_v10 = vadd.f32 %v4919_v0, %v4918_v53  ;;  %v4921_v22 = vpop.f32.mrb[90].mxu1  ;;  %vm1720_vm2 = vcmp.gt.f32.partialorder %v1688_v26, 0.0  ;;  %v4780_v19 = vpop.f32.mrb[71].mxu0 }
 0x1ac   : > { %v4922_v49 = vpop.f32.mrb[91].mxu1  ;;  %v6271_v21 = vadd.f32 %v4780_v19, %v4779_v2 }
 0x1ad   : > { %vm1721_vm4 = vcmp.gt.f32.partialorder %v1689_v23, 0.0  ;;  %v1753_v17 = vmul.f32 0.2, %v1689_v23  ;;  %v4923_v38 = vadd.f32 %v4922_v49, %v4921_v22  ;;  %3351 = vrot.lane.b32.xlu0 %v4920_v10, %s5120_s25  ;;  %v1784_v3 = vsel %vm1720_vm2, %v1688_v26, %v1752_v20 }
 0x1af   : > { %v1785_v43 = vsel %vm1721_vm4, %v1689_v23, %v1753_v17  ;;  %3353 = vrot.lane.b32.xlu1 %v4923_v38, %s5120_s25  ;;  %v1572_v9 = vpop.permute.xlu0 %1571  ;;  %v4782_v10 = vpop.f32.mrb[72].mxu0 }
 0x1b0   : > { %v4377_v35 = vpack.c.bf16 %v1785_v43, %v1784_v3  ;;  %v1652_v28 = vsel %vm1635_vm3, %v6144_v31, %v1572_v9  ;;  %v4783_v49 = vpop.f32.mrb[73].mxu0 }
 0x1b1   : > { %v1690_v37 = vadd.f32 %v6142_v1, %v1652_v28  ;;  %v4924_v27 = vpop.f32.mrb[92].mxu1  ;;  %v1574_v48 = vpop.permute.xlu1 %1573  ;;  %v6279_v7 = vadd.f32 %v4783_v49, %v4782_v10 }
 0x1b2   : > { %4505 = vst [vmem:[%s6167_s30 + $0x70] sm:$0xff] %v4377_v35   ;;  %v1653_v58 = vsel %vm1635_vm3, %v6149_v51, %v1574_v48  ;;  %v4925_v50 = vpop.f32.mrb[93].mxu1  ;;  %v4785_v17 = vpop.f32.mrb[74].mxu0 }
 0x1b3   : > { %v1754_v60 = vmul.f32 0.2, %v1690_v37  ;;  %v1691_v40 = vadd.f32 %v6142_v1, %v1653_v58  ;;  %v4926_v15 = vadd.f32 %v4925_v50, %v4924_v27  ;;  %v4927_v46 = vpop.f32.mrb[94].mxu1  ;;  %vm1722_vm5 = vcmp.gt.f32.partialorder %v1690_v37, 0.0  ;;  %v4786_v52 = vpop.f32.mrb[75].mxu0 }
 0x1b4   : > { %v4928_v34 = vpop.f32.mrb[95].mxu1  ;;  %v6284_v9 = vadd.f32 %v4786_v52, %v4785_v17 }
 0x1b5   : > { %vm1723_vm6 = vcmp.gt.f32.partialorder %v1691_v40, 0.0  ;;  %v1755_v31 = vmul.f32 0.2, %v1691_v40  ;;  %v4929_v13 = vadd.f32 %v4928_v34, %v4927_v46  ;;  %3355 = vrot.lane.b32.xlu0 %v4926_v15, %s5120_s25  ;;  %v1786_v51 = vsel %vm1722_vm5, %v1690_v37, %v1754_v60 }
 0x1b7   : > { %v1787_v4 = vsel %vm1723_vm6, %v1691_v40, %v1755_v31  ;;  %3357 = vrot.lane.b32.xlu1 %v4929_v13, %s5120_s25  ;;  %v1576_v14 = vpop.permute.xlu0 %1575  ;;  %v4788_v15 = vpop.f32.mrb[76].mxu0 }
 0x1b8   : > { %v4382_v55 = vpack.c.bf16 %v1787_v4, %v1786_v51  ;;  %v1654_v16 = vsel %vm1635_vm3, %v6157_v36, %v1576_v14  ;;  %v4789_v34 = vpop.f32.mrb[77].mxu0 }
 0x1b9   : > { %v1692_v8 = vadd.f32 %v6142_v1, %v1654_v16  ;;  %v4930_v42 = vpop.f32.mrb[96].mxu1  ;;  %v1578_v56 = vpop.permute.xlu1 %1577  ;;  %v6292_v47 = vadd.f32 %v4789_v34, %v4788_v15 }
 0x1ba   : > { %4506 = vst [vmem:[%s6167_s30 + $0x80] sm:$0xff] %v4382_v55   ;;  %v1655_v26 = vsel %vm1635_vm3, %v6162_v45, %v1578_v56  ;;  %v4931_v53 = vpop.f32.mrb[97].mxu1  ;;  %v4791_v31 = vpop.f32.mrb[78].mxu0 }
 0x1bb   : > { %v1756_v25 = vmul.f32 0.2, %v1692_v8  ;;  %v1693_v6 = vadd.f32 %v6142_v1, %v1655_v26  ;;  %v4932_v0 = vadd.f32 %v4931_v53, %v4930_v42  ;;  %v4933_v20 = vpop.f32.mrb[98].mxu1  ;;  %vm1724_vm7 = vcmp.gt.f32.partialorder %v1692_v8, 0.0  ;;  %v4792_v2 = vpop.f32.mrb[79].mxu0 }
 0x1bc   : > { %v4934_v23 = vpop.f32.mrb[99].mxu1  ;;  %v6297_v14 = vadd.f32 %v4792_v2, %v4791_v31 }
 0x1bd   : > { %vm1725_vm8 = vcmp.gt.f32.partialorder %v1693_v6, 0.0  ;;  %v1757_v36 = vmul.f32 0.2, %v1693_v6  ;;  %v4935_v22 = vadd.f32 %v4934_v23, %v4933_v20  ;;  %3359 = vrot.lane.b32.xlu0 %v4932_v0, %s5120_s25  ;;  %v1788_v45 = vsel %vm1724_vm7, %v1692_v8, %v1756_v25 }
 0x1bf   : > { %v1789_v38 = vsel %vm1725_vm8, %v1693_v6, %v1757_v36  ;;  %3361 = vrot.lane.b32.xlu1 %v4935_v22, %s5120_s25  ;;  %v1580_v39 = vpop.permute.xlu0 %1579  ;;  %v4794_v0 = vpop.f32.mrb[80].mxu0 }
 0x1c0   : > { %v4387_v3 = vpack.c.bf16 %v1789_v38, %v1788_v45  ;;  %v1656_v43 = vsel %vm1635_vm3, %v6175_v12, %v1580_v39  ;;  %v4795_v23 = vpop.f32.mrb[81].mxu0 }
 0x1c1   : > { %v1694_v61 = vadd.f32 %v6142_v1, %v1656_v43  ;;  %v4936_v35 = vpop.f32.mrb[100].mxu1  ;;  %v1582_v28 = vpop.permute.xlu1 %1581  ;;  %v6305_v10 = vadd.f32 %v4795_v23, %v4794_v0 }
 0x1c2   : > { %4507 = vst [vmem:[%s6167_s30 + $0x90] sm:$0xff] %v4387_v3   ;;  %v1657_v37 = vsel %vm1635_vm3, %v6180_v32, %v1582_v28  ;;  %v4937_v27 = vpop.f32.mrb[101].mxu1  ;;  %v4797_v36 = vpop.f32.mrb[82].mxu0 }
 0x1c3   : > { %v1758_v48 = vmul.f32 0.2, %v1694_v61  ;;  %v1695_v58 = vadd.f32 %v6142_v1, %v1657_v37  ;;  %v4938_v50 = vadd.f32 %v4937_v27, %v4936_v35  ;;  %v4939_v60 = vpop.f32.mrb[102].mxu1  ;;  %vm1726_vm9 = vcmp.gt.f32.partialorder %v1694_v61, 0.0  ;;  %v4798_v17 = vpop.f32.mrb[83].mxu0 }
 0x1c4   : > { %v4940_v40 = vpop.f32.mrb[103].mxu1  ;;  %v6310_v39 = vadd.f32 %v4798_v17, %v4797_v36 }
 0x1c5   : > { %vm1727_vm10 = vcmp.gt.f32.partialorder %v1695_v58, 0.0  ;;  %v1759_v12 = vmul.f32 0.2, %v1695_v58  ;;  %v4941_v46 = vadd.f32 %v4940_v40, %v4939_v60  ;;  %3363 = vrot.lane.b32.xlu0 %v4938_v50, %s5120_s25  ;;  %v1790_v32 = vsel %vm1726_vm9, %v1694_v61, %v1758_v48 }
 0x1c7   : > { %v1791_v13 = vsel %vm1727_vm10, %v1695_v58, %v1759_v12  ;;  %3365 = vrot.lane.b32.xlu1 %v4941_v46, %s5120_s25  ;;  %v1584_v63 = vpop.permute.xlu0 %1583  ;;  %v4800_v50 = vpop.f32.mrb[84].mxu0 }
 0x1c8   : > { %v4392_v51 = vpack.c.bf16 %v1791_v13, %v1790_v32  ;;  %v1658_v4 = vsel %vm1635_vm3, %v6188_v11, %v1584_v63  ;;  %v4801_v40 = vpop.f32.mrb[85].mxu0 }
 0x1c9   : > { %v1696_v19 = vadd.f32 %v6142_v1, %v1658_v4  ;;  %v4942_v55 = vpop.f32.mrb[104].mxu1  ;;  %v1586_v16 = vpop.permute.xlu1 %1585  ;;  %v6318_v15 = vadd.f32 %v4801_v40, %v4800_v50 }
 0x1ca   : > { %4508 = vst [vmem:[%s6167_s30 + $0xa0] sm:$0xff] %v4392_v51   ;;  %v1659_v8 = vsel %vm1635_vm3, %v6193_v24, %v1586_v16  ;;  %v4943_v42 = vpop.f32.mrb[105].mxu1  ;;  %v4803_v12 = vpop.f32.mrb[86].mxu0 }
 0x1cb   : > { %v1760_v56 = vmul.f32 0.2, %v1696_v19  ;;  %v1697_v26 = vadd.f32 %v6142_v1, %v1659_v8  ;;  %v4944_v53 = vadd.f32 %v4943_v42, %v4942_v55  ;;  %v4945_v25 = vpop.f32.mrb[106].mxu1  ;;  %vm1728_vm11 = vcmp.gt.f32.partialorder %v1696_v19, 0.0  ;;  %v4804_v31 = vpop.f32.mrb[87].mxu0 }
 0x1cc   : > { %v4946_v6 = vpop.f32.mrb[107].mxu1  ;;  %v6323_v63 = vadd.f32 %v4804_v31, %v4803_v12 }
 0x1cd   : > { %vm1729_vm12 = vcmp.gt.f32.partialorder %v1697_v26, 0.0  ;;  %v1761_v11 = vmul.f32 0.2, %v1697_v26  ;;  %v4947_v20 = vadd.f32 %v4946_v6, %v4945_v25  ;;  %3367 = vrot.lane.b32.xlu0 %v4944_v53, %s5120_s25  ;;  %v1792_v24 = vsel %vm1728_vm11, %v1696_v19, %v1760_v56 }
 0x1cf   : > { %v1793_v22 = vsel %vm1729_vm12, %v1697_v26, %v1761_v11  ;;  %3369 = vrot.lane.b32.xlu1 %v4947_v20, %s5120_s25  ;;  %v1588_v49 = vpop.permute.xlu0 %1587  ;;  %v4806_v53 = vpop.f32.mrb[88].mxu0 }
 0x1d0   : > { %v4397_v45 = vpack.c.bf16 %v1793_v22, %v1792_v24  ;;  %v1660_v38 = vsel %vm1635_vm3, %v6201_v57, %v1588_v49  ;;  %v4807_v6 = vpop.f32.mrb[89].mxu0 }
 0x1d1   : > { %v1698_v52 = vadd.f32 %v6142_v1, %v1660_v38  ;;  %v4948_v3 = vpop.f32.mrb[108].mxu1  ;;  %v1590_v43 = vpop.permute.xlu1 %1589  ;;  %v6331_v0 = vadd.f32 %v4807_v6, %v4806_v53 }
 0x1d2   : > { %4509 = vst [vmem:[%s6167_s30 + $0xb0] sm:$0xff] %v4397_v45   ;;  %v1661_v61 = vsel %vm1635_vm3, %v6206_v29, %v1590_v43  ;;  %v4949_v35 = vpop.f32.mrb[109].mxu1  ;;  %v4809_v11 = vpop.f32.mrb[90].mxu0 }
 0x1d3   : > { %v1762_v28 = vmul.f32 0.2, %v1698_v52  ;;  %v1699_v37 = vadd.f32 %v6142_v1, %v1661_v61  ;;  %v4950_v27 = vadd.f32 %v4949_v35, %v4948_v3  ;;  %v4951_v48 = vpop.f32.mrb[110].mxu1  ;;  %vm1730_vm13 = vcmp.gt.f32.partialorder %v1698_v52, 0.0  ;;  %v4810_v36 = vpop.f32.mrb[91].mxu0 }
 0x1d4   : > { %v4952_v58 = vpop.f32.mrb[111].mxu1  ;;  %v6336_v49 = vadd.f32 %v4810_v36, %v4809_v11 }
 0x1d5   : > { %vm1731_vm14 = vcmp.gt.f32.partialorder %v1699_v37, 0.0  ;;  %v1763_v57 = vmul.f32 0.2, %v1699_v37  ;;  %v4953_v60 = vadd.f32 %v4952_v58, %v4951_v48  ;;  %3371 = vrot.lane.b32.xlu0 %v4950_v27, %s5120_s25  ;;  %v1794_v29 = vsel %vm1730_vm13, %v1698_v52, %v1762_v28 }
 0x1d7   : > { %v1795_v46 = vsel %vm1731_vm14, %v1699_v37, %v1763_v57  ;;  %3373 = vrot.lane.b32.xlu1 %v4953_v60, %s5120_s25  ;;  %v1592_v34 = vpop.permute.xlu0 %1591  ;;  %v4812_v27 = vpop.f32.mrb[92].mxu0 }
 0x1d8   : > { %v4402_v32 = vpack.c.bf16 %v1795_v46, %v1794_v29  ;;  %v1662_v13 = vsel %vm1635_vm3, %v6214_v33, %v1592_v34  ;;  %v4813_v58 = vpop.f32.mrb[93].mxu0 }
 0x1d9   : > { %v1700_v2 = vadd.f32 %v6142_v1, %v1662_v13  ;;  %v4954_v51 = vpop.f32.mrb[112].mxu1  ;;  %v1594_v4 = vpop.permute.xlu1 %1593  ;;  %v6344_v50 = vadd.f32 %v4813_v58, %v4812_v27 }
 0x1da   : > { %4510 = vst [vmem:[%s6167_s30 + $0xc0] sm:$0xff] %v4402_v32   ;;  %v1663_v19 = vsel %vm1635_vm3, %v6219_v18, %v1594_v4  ;;  %v4955_v55 = vpop.f32.mrb[113].mxu1  ;;  %v4815_v57 = vpop.f32.mrb[94].mxu0 }
 0x1db   : > { %v1764_v16 = vmul.f32 0.2, %v1700_v2  ;;  %v1701_v8 = vadd.f32 %v6142_v1, %v1663_v19  ;;  %v4956_v42 = vadd.f32 %v4955_v55, %v4954_v51  ;;  %v4957_v56 = vpop.f32.mrb[114].mxu1  ;;  %vm1732_vm15 = vcmp.gt.f32.partialorder %v1700_v2, 0.0  ;;  %v4816_v12 = vpop.f32.mrb[95].mxu0 }
 0x1dc   : > { %v4958_v26 = vpop.f32.mrb[115].mxu1  ;;  %v6349_v34 = vadd.f32 %v4816_v12, %v4815_v57 }
 0x1dd   : > { %vm1733_vm0 = vcmp.gt.f32.partialorder %v1701_v8, 0.0  ;;  %v1765_v33 = vmul.f32 0.2, %v1701_v8  ;;  %v4959_v25 = vadd.f32 %v4958_v26, %v4957_v56  ;;  %3375 = vrot.lane.b32.xlu0 %v4956_v42, %s5120_s25  ;;  %v1796_v18 = vsel %vm1732_vm15, %v1700_v2, %v1764_v16 }
 0x1df   : > { %v1797_v20 = vsel %vm1733_vm0, %v1701_v8, %v1765_v33  ;;  %3377 = vrot.lane.b32.xlu1 %v4959_v25, %s5120_s25  ;;  %v1596_v23 = vpop.permute.xlu0 %1595  ;;  %v4818_v42 = vpop.f32.mrb[96].mxu0 }
 0x1e0   : > { %v4407_v24 = vpack.c.bf16 %v1797_v20, %v1796_v18  ;;  %v1664_v22 = vsel %vm1635_vm3, %v6227_v59, %v1596_v23  ;;  %v4819_v26 = vpop.f32.mrb[97].mxu0 }
 0x1e1   : > { %v1702_v17 = vadd.f32 %v6142_v1, %v1664_v22  ;;  %v4960_v45 = vpop.f32.mrb[116].mxu1  ;;  %v1598_v38 = vpop.permute.xlu1 %1597  ;;  %v6357_v53 = vadd.f32 %v4819_v26, %v4818_v42 }
 0x1e2   : > { %4511 = vst [vmem:[%s6167_s30 + $0xd0] sm:$0xff] %v4407_v24   ;;  %v1665_v52 = vsel %vm1635_vm3, %v6232_v30, %v1598_v38  ;;  %v4961_v3 = vpop.f32.mrb[117].mxu1  ;;  %v4821_v33 = vpop.f32.mrb[98].mxu0 }
 0x1e3   : > { %v1766_v43 = vmul.f32 0.2, %v1702_v17  ;;  %v1703_v61 = vadd.f32 %v6142_v1, %v1665_v52  ;;  %v4962_v35 = vadd.f32 %v4961_v3, %v4960_v45  ;;  %v4963_v28 = vpop.f32.mrb[118].mxu1  ;;  %vm1734_vm1 = vcmp.gt.f32.partialorder %v1702_v17, 0.0  ;;  %v4822_v11 = vpop.f32.mrb[99].mxu0 }
 0x1e4   : > { %v4964_v37 = vpop.f32.mrb[119].mxu1  ;;  %v6362_v23 = vadd.f32 %v4822_v11, %v4821_v33 }
 0x1e5   : > { %vm1735_vm2 = vcmp.gt.f32.partialorder %v1703_v61, 0.0  ;;  %v1767_v59 = vmul.f32 0.2, %v1703_v61  ;;  %v4965_v48 = vadd.f32 %v4964_v37, %v4963_v28  ;;  %3379 = vrot.lane.b32.xlu0 %v4962_v35, %s5120_s25  ;;  %v1798_v30 = vsel %vm1734_vm1, %v1702_v17, %v1766_v43 }
 0x1e7   : > { %v1799_v60 = vsel %vm1735_vm2, %v1703_v61, %v1767_v59  ;;  %3381 = vrot.lane.b32.xlu1 %v4965_v48, %s5120_s25  ;;  %v1600_v40 = vpop.permute.xlu0 %1599  ;;  %v4824_v35 = vpop.f32.mrb[100].mxu0 }
 0x1e8   : > { %v4412_v29 = vpack.c.bf16 %v1799_v60, %v1798_v30  ;;  %v1666_v46 = vsel %vm1635_vm3, %v6240_v41, %v1600_v40  ;;  %v4825_v37 = vpop.f32.mrb[101].mxu0 }
 0x1e9   : > { %v1704_v31 = vadd.f32 %v6142_v1, %v1666_v46  ;;  %v4966_v32 = vpop.f32.mrb[120].mxu1  ;;  %v1602_v13 = vpop.permute.xlu1 %1601  ;;  %v6370_v27 = vadd.f32 %v4825_v37, %v4824_v35 }
 0x1ea   : > { %4512 = vst [vmem:[%s6167_s30 + $0xe0] sm:$0xff] %v4412_v29   ;;  %v1667_v2 = vsel %vm1635_vm3, %v6245_v62, %v1602_v13  ;;  %v4967_v51 = vpop.f32.mrb[121].mxu1  ;;  %v4827_v59 = vpop.f32.mrb[102].mxu0 }
 0x1eb   : > { %v1768_v4 = vmul.f32 0.2, %v1704_v31  ;;  %v1705_v19 = vadd.f32 %v6142_v1, %v1667_v2  ;;  %v4968_v55 = vadd.f32 %v4967_v51, %v4966_v32  ;;  %v4969_v16 = vpop.f32.mrb[122].mxu1  ;;  %vm1736_vm4 = vcmp.gt.f32.partialorder %v1704_v31, 0.0  ;;  %v4828_v57 = vpop.f32.mrb[103].mxu0 }
 0x1ec   : > { %v4970_v8 = vpop.f32.mrb[123].mxu1  ;;  %v6375_v40 = vadd.f32 %v4828_v57, %v4827_v59 }
 0x1ed   : > { %vm1737_vm5 = vcmp.gt.f32.partialorder %v1705_v19, 0.0  ;;  %v1769_v41 = vmul.f32 0.2, %v1705_v19  ;;  %v4971_v56 = vadd.f32 %v4970_v8, %v4969_v16  ;;  %3383 = vrot.lane.b32.xlu0 %v4968_v55, %s5120_s25  ;;  %v1800_v62 = vsel %vm1736_vm4, %v1704_v31, %v1768_v4 }
 0x1ef   : > { %v1801_v25 = vsel %vm1737_vm5, %v1705_v19, %v1769_v41  ;;  %3385 = vrot.lane.b32.xlu1 %v4971_v56, %s5120_s25  ;;  %v3328_v6 = vpop.permute.xlu0 %3327  ;;  %v4830_v13 = vpop.f32.mrb[104].mxu0 }
 0x1f0   : > { %v4417_v18 = vpack.c.bf16 %v1801_v25, %v1800_v62  ;;  %v3423_v20 = vsel %vm1635_vm3, %v6253_v54, %v3328_v6  ;;  %v4831_v51 = vpop.f32.mrb[105].mxu0 }
 0x1f1   : > { %v3455_v36 = vadd.f32 %v6142_v1, %v3423_v20  ;;  %v4972_v24 = vpop.f32.mrb[124].mxu1  ;;  %v3330_v22 = vpop.permute.xlu1 %3329  ;;  %v6382_v4 = vadd.f32 %v4831_v51, %v4830_v13 }
 0x1f2   : > { %4513 = vst [vmem:[%s6167_s30 + $0xf0] sm:$0xff] %v4417_v18   ;;  %v3424_v17 = vsel %vm1635_vm3, %v6258_v44, %v3330_v22  ;;  %v4973_v45 = vpop.f32.mrb[125].mxu1 }
 0x1f3   : > { %v3519_v38 = vmul.f32 0.2, %v3455_v36  ;;  %v3456_v52 = vadd.f32 %v6142_v1, %v3424_v17  ;;  %v4974_v3 = vadd.f32 %v4973_v45, %v4972_v24  ;;  %v4975_v43 = vpop.f32.mrb[126].mxu1  ;;  %vm3487_vm6 = vcmp.gt.f32.partialorder %v3455_v36, 0.0 }
 0x1f4   : > { %v4976_v61 = vpop.f32.mrb[127].mxu1 }
 0x1f5   : > { %vm3488_vm7 = vcmp.gt.f32.partialorder %v3456_v52, 0.0  ;;  %v3520_v54 = vmul.f32 0.2, %v3456_v52  ;;  %v4977_v28 = vadd.f32 %v4976_v61, %v4975_v43  ;;  %3387 = vrot.lane.b32.xlu0 %v4974_v3, %s5120_s25  ;;  %v3551_v44 = vsel %vm3487_vm6, %v3455_v36, %v3519_v38 }
 0x1f7   : > { %v3552_v48 = vsel %vm3488_vm7, %v3456_v52, %v3520_v54  ;;  %3389 = vrot.lane.b32.xlu1 %v4977_v28, %s5120_s25  ;;  %v3332_v58 = vpop.permute.xlu0 %3331 }
 0x1f8   : > { %v4422_v30 = vpack.c.bf16 %v3552_v48, %v3551_v44  ;;  %v3425_v60 = vsel %vm1635_vm3, %v6266_v5, %v3332_v58  ;;  %v4833_v5 = vpop.f32.mrb[106].mxu0 }
 0x1f9   : > { %v3457_v12 = vadd.f32 %v6142_v1, %v3425_v60  ;;  %v3334_v29 = vpop.permute.xlu1 %3333  ;;  %v4834_v8 = vpop.f32.mrb[107].mxu0 }
 0x1fa   : > { %4514 = vst [vmem:[%s6167_s30 + $0x8] sm:$0xff] %v4422_v30   ;;  %v3426_v46 = vsel %vm1635_vm3, %v6271_v21, %v3334_v29  ;;  %v6386_v41 = vadd.f32 %v4834_v8, %v4833_v5  ;;  %v4836_v6 = vpop.f32.mrb[108].mxu0 }
 0x1fb   : > { %v3521_v31 = vmul.f32 0.2, %v3457_v12  ;;  %v3458_v32 = vadd.f32 %v6142_v1, %v3426_v46  ;;  %vm3489_vm8 = vcmp.gt.f32.partialorder %v3457_v12, 0.0  ;;  %v4837_v18 = vpop.f32.mrb[109].mxu0 }
 0x1fc   : > { %v6393_v20 = vadd.f32 %v4837_v18, %v4836_v6 }
 0x1fd   : > { %vm3490_vm9 = vcmp.gt.f32.partialorder %v3458_v32, 0.0  ;;  %v3522_v2 = vmul.f32 0.2, %v3458_v32  ;;  %v3553_v19 = vsel %vm3489_vm8, %v3457_v12, %v3521_v31 }
 0x1ff   : > { %v3554_v55 = vsel %vm3490_vm9, %v3458_v32, %v3522_v2  ;;  %v3336_v16 = vpop.permute.xlu0 %3335 }
 0x200   : > { %v4427_v42 = vpack.c.bf16 %v3554_v55, %v3553_v19  ;;  %v3427_v21 = vsel %vm1635_vm3, %v6279_v7, %v3336_v16  ;;  %v4839_v7 = vpop.f32.mrb[110].mxu0 }
 0x201   : > { %v3459_v56 = vadd.f32 %v6142_v1, %v3427_v21  ;;  %v3338_v26 = vpop.permute.xlu1 %3337  ;;  %v4840_v17 = vpop.f32.mrb[111].mxu0 }
 0x202   : > { %4515 = vst [vmem:[%s6167_s30 + $0x18] sm:$0xff] %v4427_v42   ;;  %v3428_v33 = vsel %vm1635_vm3, %v6284_v9, %v3338_v26  ;;  %v6397_v38 = vadd.f32 %v4840_v17, %v4839_v7 }
 0x203   : > { %v3523_v62 = vmul.f32 0.2, %v3459_v56  ;;  %v3460_v25 = vadd.f32 %v6142_v1, %v3428_v33  ;;  %vm3491_vm10 = vcmp.gt.f32.partialorder %v3459_v56, 0.0  ;;  %v6402_v1 = vld [vmem:[%s6515_s2] ss:$0 sm:$0xff] }
 0x205   : > { %vm3492_vm11 = vcmp.gt.f32.partialorder %v3460_v25, 0.0  ;;  %v3524_v11 = vmul.f32 0.2, %v3460_v25  ;;  %v3555_v36 = vsel %vm3491_vm10, %v3459_v56, %v3523_v62 }
 0x207   : > { %v3556_v24 = vsel %vm3492_vm11, %v3460_v25, %v3524_v11  ;;  %v3340_v22 = vpop.permute.xlu0 %3339 }
 0x208   : > { %v4432_v45 = vpack.c.bf16 %v3556_v24, %v3555_v36  ;;  %v3429_v9 = vsel %vm1635_vm3, %v6292_v47, %v3340_v22  ;;  %v4842_v47 = vpop.f32.mrb[112].mxu0 }
 0x209   : > { %v3461_v52 = vadd.f32 %v6402_v1, %v3429_v9  ;;  %v3342_v3 = vpop.permute.xlu1 %3341  ;;  %v4843_v28 = vpop.f32.mrb[113].mxu0 }
 0x20a   : > { %4516 = vst [vmem:[%s6167_s30 + $0x28] sm:$0xff] %v4432_v45   ;;  %v3430_v43 = vsel %vm1635_vm3, %v6297_v14, %v3342_v3  ;;  %v6409_v37 = vadd.f32 %v4843_v28, %v4842_v47  ;;  %v4845_v59 = vpop.f32.mrb[114].mxu0 }
 0x20b   : > { %v3525_v61 = vmul.f32 0.2, %v3461_v52  ;;  %v3462_v35 = vadd.f32 %v6402_v1, %v3430_v43  ;;  %vm3493_vm12 = vcmp.gt.f32.partialorder %v3461_v52, 0.0  ;;  %v4846_v57 = vpop.f32.mrb[115].mxu0 }
 0x20c   : > { %v6413_v60 = vadd.f32 %v4846_v57, %v4845_v59  ;;  %v4848_v13 = vpop.f32.mrb[116].mxu0 }
 0x20d   : > { %vm3494_vm13 = vcmp.gt.f32.partialorder %v3462_v35, 0.0  ;;  %v3526_v54 = vmul.f32 0.2, %v3462_v35  ;;  %v3557_v44 = vsel %vm3493_vm12, %v3461_v52, %v3525_v61  ;;  %v4849_v51 = vpop.f32.mrb[117].mxu0 }
 0x20e   : > { %v6420_v5 = vadd.f32 %v4849_v51, %v4848_v13 }
 0x20f   : > { %v3558_v48 = vsel %vm3494_vm13, %v3462_v35, %v3526_v54  ;;  %v3344_v58 = vpop.permute.xlu0 %3343 }
 0x210   : > { %v4437_v30 = vpack.c.bf16 %v3558_v48, %v3557_v44  ;;  %v3431_v14 = vsel %vm1635_vm3, %v6305_v10, %v3344_v58  ;;  %v4851_v10 = vpop.f32.mrb[118].mxu0 }
 0x211   : > { %v3463_v12 = vadd.f32 %v6402_v1, %v3431_v14  ;;  %v3346_v29 = vpop.permute.xlu1 %3345  ;;  %v4852_v8 = vpop.f32.mrb[119].mxu0 }
 0x212   : > { %4517 = vst [vmem:[%s6167_s30 + $0x38] sm:$0xff] %v4437_v30   ;;  %v3432_v46 = vsel %vm1635_vm3, %v6310_v39, %v3346_v29  ;;  %v6424_v21 = vadd.f32 %v4852_v8, %v4851_v10  ;;  %v4854_v6 = vpop.f32.mrb[120].mxu0 }
 0x213   : > { %v3527_v31 = vmul.f32 0.2, %v3463_v12  ;;  %v3464_v32 = vadd.f32 %v6402_v1, %v3432_v46  ;;  %vm3495_vm14 = vcmp.gt.f32.partialorder %v3463_v12, 0.0  ;;  %v4855_v18 = vpop.f32.mrb[121].mxu0 }
 0x214   : > { %v6431_v7 = vadd.f32 %v4855_v18, %v4854_v6 }
 0x215   : > { %vm3496_vm15 = vcmp.gt.f32.partialorder %v3464_v32, 0.0  ;;  %v3528_v2 = vmul.f32 0.2, %v3464_v32  ;;  %v3559_v19 = vsel %vm3495_vm14, %v3463_v12, %v3527_v31 }
 0x217   : > { %v3560_v55 = vsel %vm3496_vm15, %v3464_v32, %v3528_v2  ;;  %v3348_v16 = vpop.permute.xlu0 %3347 }
 0x218   : > { %v4442_v42 = vpack.c.bf16 %v3560_v55, %v3559_v19  ;;  %v3433_v39 = vsel %vm1635_vm3, %v6318_v15, %v3348_v16  ;;  %v4857_v15 = vpop.f32.mrb[122].mxu0 }
 0x219   : > { %v3465_v56 = vadd.f32 %v6402_v1, %v3433_v39  ;;  %v3350_v26 = vpop.permute.xlu1 %3349  ;;  %v4858_v17 = vpop.f32.mrb[123].mxu0 }
 0x21a   : > { %4518 = vst [vmem:[%s6167_s30 + $0x48] sm:$0xff] %v4442_v42   ;;  %v3434_v33 = vsel %vm1635_vm3, %v6323_v63, %v3350_v26  ;;  %v6435_v9 = vadd.f32 %v4858_v17, %v4857_v15  ;;  %v4860_v47 = vpop.f32.mrb[124].mxu0 }
 0x21b   : > { %v3529_v62 = vmul.f32 0.2, %v3465_v56  ;;  %v3466_v25 = vadd.f32 %v6402_v1, %v3434_v33  ;;  %vm3497_vm0 = vcmp.gt.f32.partialorder %v3465_v56, 0.0  ;;  %v4861_v28 = vpop.f32.mrb[125].mxu0 }
 0x21c   : > { %v6442_v59 = vadd.f32 %v4861_v28, %v4860_v47 }
 0x21d   : > { %vm3498_vm1 = vcmp.gt.f32.partialorder %v3466_v25, 0.0  ;;  %v3530_v11 = vmul.f32 0.2, %v3466_v25  ;;  %v3561_v36 = vsel %vm3497_vm0, %v3465_v56, %v3529_v62 }
 0x21f   : > { %v3562_v24 = vsel %vm3498_vm1, %v3466_v25, %v3530_v11  ;;  %v3352_v22 = vpop.permute.xlu0 %3351 }
 0x220   : > { %v4447_v45 = vpack.c.bf16 %v3562_v24, %v3561_v36  ;;  %v3435_v63 = vsel %vm1635_vm3, %v6331_v0, %v3352_v22  ;;  %v4863_v0 = vpop.f32.mrb[126].mxu0 }
 0x221   : > { %v3467_v52 = vadd.f32 %v6402_v1, %v3435_v63  ;;  %v3354_v3 = vpop.permute.xlu1 %3353  ;;  %v4864_v57 = vpop.f32.mrb[127].mxu0 }
 0x222   : > { %4519 = vst [vmem:[%s6167_s30 + $0x58] sm:$0xff] %v4447_v45   ;;  %v3436_v43 = vsel %vm1635_vm3, %v6336_v49, %v3354_v3  ;;  %v6446_v14 = vadd.f32 %v4864_v57, %v4863_v0 }
 0x223   : > { %v3531_v61 = vmul.f32 0.2, %v3467_v52  ;;  %v3468_v35 = vadd.f32 %v6402_v1, %v3436_v43  ;;  %vm3499_vm2 = vcmp.gt.f32.partialorder %v3467_v52, 0.0 }
 0x225   : > { %vm3500_vm4 = vcmp.gt.f32.partialorder %v3468_v35, 0.0  ;;  %v3532_v54 = vmul.f32 0.2, %v3468_v35  ;;  %v3563_v44 = vsel %vm3499_vm2, %v3467_v52, %v3531_v61 }
 0x227   : > { %v3564_v48 = vsel %vm3500_vm4, %v3468_v35, %v3532_v54  ;;  %v3356_v58 = vpop.permute.xlu0 %3355 }
 0x228   : > { %v4452_v30 = vpack.c.bf16 %v3564_v48, %v3563_v44  ;;  %v3437_v49 = vsel %vm1635_vm3, %v6344_v50, %v3356_v58 }
 0x229   : > { %v3469_v12 = vadd.f32 %v6402_v1, %v3437_v49  ;;  %v3358_v29 = vpop.permute.xlu1 %3357 }
 0x22a   : > { %4520 = vst [vmem:[%s6167_s30 + $0x68] sm:$0xff] %v4452_v30   ;;  %v3438_v46 = vsel %vm1635_vm3, %v6349_v34, %v3358_v29 }
 0x22b   : > { %v3533_v31 = vmul.f32 0.2, %v3469_v12  ;;  %v3470_v32 = vadd.f32 %v6402_v1, %v3438_v46  ;;  %vm3501_vm5 = vcmp.gt.f32.partialorder %v3469_v12, 0.0 }
 0x22d   : > { %vm3502_vm6 = vcmp.gt.f32.partialorder %v3470_v32, 0.0  ;;  %v3534_v13 = vmul.f32 0.2, %v3470_v32  ;;  %v3565_v2 = vsel %vm3501_vm5, %v3469_v12, %v3533_v31 }
 0x22f   : > { %v3566_v51 = vsel %vm3502_vm6, %v3470_v32, %v3534_v13  ;;  %v3360_v10 = vpop.permute.xlu0 %3359 }
 0x230   : > { %v4457_v50 = vpack.c.bf16 %v3566_v51, %v3565_v2  ;;  %v3439_v19 = vsel %vm1635_vm3, %v6357_v53, %v3360_v10 }
 0x231   : > { %v3471_v55 = vadd.f32 %v6402_v1, %v3439_v19  ;;  %v3362_v16 = vpop.permute.xlu1 %3361 }
 0x232   : > { %4521 = vst [vmem:[%s6167_s30 + $0x78] sm:$0xff] %v4457_v50   ;;  %v3440_v34 = vsel %vm1635_vm3, %v6362_v23, %v3362_v16 }
 0x233   : > { %v3535_v8 = vmul.f32 0.2, %v3471_v55  ;;  %v3472_v42 = vadd.f32 %v6402_v1, %v3440_v34  ;;  %vm3503_vm7 = vcmp.gt.f32.partialorder %v3471_v55, 0.0 }
 0x235   : > { %vm3504_vm8 = vcmp.gt.f32.partialorder %v3472_v42, 0.0  ;;  %v3536_v39 = vmul.f32 0.2, %v3472_v42  ;;  %v3567_v56 = vsel %vm3503_vm7, %v3471_v55, %v3535_v8 }
 0x237   : > { %v3568_v26 = vsel %vm3504_vm8, %v3472_v42, %v3536_v39  ;;  %v3364_v33 = vpop.permute.xlu0 %3363 }
 0x238   : > { %v4462_v62 = vpack.c.bf16 %v3568_v26, %v3567_v56  ;;  %v3441_v53 = vsel %vm1635_vm3, %v6370_v27, %v3364_v33 }
 0x239   : > { %v3473_v25 = vadd.f32 %v6402_v1, %v3441_v53  ;;  %v3366_v6 = vpop.permute.xlu1 %3365 }
 0x23a   : > { %4522 = vst [vmem:[%s6167_s30 + $0x88] sm:$0xff] %v4462_v62   ;;  %v3442_v23 = vsel %vm1635_vm3, %v6375_v40, %v3366_v6 }
 0x23b   : > { %v3537_v11 = vmul.f32 0.2, %v3473_v25  ;;  %v3474_v18 = vadd.f32 %v6402_v1, %v3442_v23  ;;  %vm3505_vm9 = vcmp.gt.f32.partialorder %v3473_v25, 0.0 }
 0x23d   : > { %vm3506_vm10 = vcmp.gt.f32.partialorder %v3474_v18, 0.0  ;;  %v3538_v15 = vmul.f32 0.2, %v3474_v18  ;;  %v3569_v36 = vsel %vm3505_vm9, %v3473_v25, %v3537_v11 }
 0x23f   : > { %v3570_v24 = vsel %vm3506_vm10, %v3474_v18, %v3538_v15  ;;  %v3368_v22 = vpop.permute.xlu0 %3367 }
 0x240   : > { %v4467_v17 = vpack.c.bf16 %v3570_v24, %v3569_v36  ;;  %v3443_v27 = vsel %vm1635_vm3, %v6382_v4, %v3368_v22 }
 0x241   : > { %v3475_v45 = vadd.f32 %v6402_v1, %v3443_v27  ;;  %v3370_v63 = vpop.permute.xlu1 %3369 }
 0x242   : > { %4523 = vst [vmem:[%s6167_s30 + $0x98] sm:$0xff] %v4467_v17   ;;  %v3444_v40 = vsel %vm1635_vm3, %v6386_v41, %v3370_v63 }
 0x243   : > { %v3539_v52 = vmul.f32 0.2, %v3475_v45  ;;  %v3476_v3 = vadd.f32 %v6402_v1, %v3444_v40  ;;  %vm3507_vm11 = vcmp.gt.f32.partialorder %v3475_v45, 0.0 }
 0x245   : > { %vm3508_vm12 = vcmp.gt.f32.partialorder %v3476_v3, 0.0  ;;  %v3540_v43 = vmul.f32 0.2, %v3476_v3  ;;  %v3571_v61 = vsel %vm3507_vm11, %v3475_v45, %v3539_v52 }
 0x247   : > { %v3572_v35 = vsel %vm3508_vm12, %v3476_v3, %v3540_v43  ;;  %v3372_v47 = vpop.permute.xlu0 %3371 }
 0x248   : > { %v4472_v54 = vpack.c.bf16 %v3572_v35, %v3571_v61  ;;  %v3445_v4 = vsel %vm1635_vm3, %v6393_v20, %v3372_v47 }
 0x249   : > { %v3477_v28 = vadd.f32 %v6402_v1, %v3445_v4  ;;  %v3374_v0 = vpop.permute.xlu1 %3373 }
 0x24a   : > { %4524 = vst [vmem:[%s6167_s30 + $0xa8] sm:$0xff] %v4472_v54   ;;  %v3446_v41 = vsel %vm1635_vm3, %v6397_v38, %v3374_v0 }
 0x24b   : > { %v3541_v44 = vmul.f32 0.2, %v3477_v28  ;;  %v3478_v48 = vadd.f32 %v6402_v1, %v3446_v41  ;;  %vm3509_vm13 = vcmp.gt.f32.partialorder %v3477_v28, 0.0 }
 0x24d   : > { %vm3510_vm14 = vcmp.gt.f32.partialorder %v3478_v48, 0.0  ;;  %v3542_v58 = vmul.f32 0.2, %v3478_v48  ;;  %v3573_v57 = vsel %vm3509_vm13, %v3477_v28, %v3541_v44 }
 0x24f   : > { %v3574_v30 = vsel %vm3510_vm14, %v3478_v48, %v3542_v58  ;;  %v3376_v49 = vpop.permute.xlu0 %3375 }
 0x250   : > { %v4477_v12 = vpack.c.bf16 %v3574_v30, %v3573_v57  ;;  %v3447_v20 = vsel %vm1635_vm3, %v6409_v37, %v3376_v49 }
 0x251   : > { %v3479_v29 = vadd.f32 %v6402_v1, %v3447_v20  ;;  %v3378_v46 = vpop.permute.xlu1 %3377 }
 0x252   : > { %4525 = vst [vmem:[%s6167_s30 + $0xb8] sm:$0xff] %v4477_v12   ;;  %v3448_v38 = vsel %vm1635_vm3, %v6413_v60, %v3378_v46 }
 0x253   : > { %v3543_v31 = vmul.f32 0.2, %v3479_v29  ;;  %v3480_v32 = vadd.f32 %v6402_v1, %v3448_v38  ;;  %vm3511_vm15 = vcmp.gt.f32.partialorder %v3479_v29, 0.0 }
 0x255   : > { %vm3512_vm0 = vcmp.gt.f32.partialorder %v3480_v32, 0.0  ;;  %v3544_v13 = vmul.f32 0.2, %v3480_v32  ;;  %v3575_v2 = vsel %vm3511_vm15, %v3479_v29, %v3543_v31 }
 0x257   : > { %v3576_v51 = vsel %vm3512_vm0, %v3480_v32, %v3544_v13  ;;  %v3380_v10 = vpop.permute.xlu0 %3379 }
 0x258   : > { %v4482_v50 = vpack.c.bf16 %v3576_v51, %v3575_v2  ;;  %v3449_v37 = vsel %vm1635_vm3, %v6420_v5, %v3380_v10 }
 0x259   : > { %v3481_v19 = vadd.f32 %v6402_v1, %v3449_v37  ;;  %v3382_v55 = vpop.permute.xlu1 %3381 }
 0x25a   : > { %4526 = vst [vmem:[%s6167_s30 + $0xc8] sm:$0xff] %v4482_v50   ;;  %v3450_v60 = vsel %vm1635_vm3, %v6424_v21, %v3382_v55 }
 0x25b   : > { %v3545_v16 = vmul.f32 0.2, %v3481_v19  ;;  %v3482_v34 = vadd.f32 %v6402_v1, %v3450_v60  ;;  %vm3513_vm1 = vcmp.gt.f32.partialorder %v3481_v19, 0.0 }
 0x25d   : > { %vm3514_vm2 = vcmp.gt.f32.partialorder %v3482_v34, 0.0  ;;  %v3546_v8 = vmul.f32 0.2, %v3482_v34  ;;  %v3577_v42 = vsel %vm3513_vm1, %v3481_v19, %v3545_v16 }
 0x25f   : > { %v3578_v39 = vsel %vm3514_vm2, %v3482_v34, %v3546_v8  ;;  %v3384_v56 = vpop.permute.xlu0 %3383 }
 0x260   : > { %v4487_v26 = vpack.c.bf16 %v3578_v39, %v3577_v42  ;;  %v3451_v5 = vsel %vm1635_vm3, %v6431_v7, %v3384_v56 }
 0x261   : > { %v3483_v33 = vadd.f32 %v6402_v1, %v3451_v5  ;;  %v3386_v62 = vpop.permute.xlu1 %3385 }
 0x262   : > { %4527 = vst [vmem:[%s6167_s30 + $0xd8] sm:$0xff] %v4487_v26   ;;  %v3452_v21 = vsel %vm1635_vm3, %v6435_v9, %v3386_v62 }
 0x263   : > { %v3547_v53 = vmul.f32 0.2, %v3483_v33  ;;  %v3484_v25 = vadd.f32 %v6402_v1, %v3452_v21  ;;  %vm3515_vm4 = vcmp.gt.f32.partialorder %v3483_v33, 0.0 }
 0x265   : > { %vm3516_vm5 = vcmp.gt.f32.partialorder %v3484_v25, 0.0  ;;  %v3548_v6 = vmul.f32 0.2, %v3484_v25  ;;  %v3579_v23 = vsel %vm3515_vm4, %v3483_v33, %v3547_v53 }
 0x267   : > { %v3580_v11 = vsel %vm3516_vm5, %v3484_v25, %v3548_v6  ;;  %v3388_v18 = vpop.permute.xlu0 %3387 }
 0x268   : > { %v4492_v15 = vpack.c.bf16 %v3580_v11, %v3579_v23  ;;  %v3453_v7 = vsel %vm1635_vm3, %v6442_v59, %v3388_v18 }
 0x269   : > { %v3485_v36 = vadd.f32 %v6402_v1, %v3453_v7  ;;  %v3390_v24 = vpop.permute.xlu1 %3389 }
 0x26a   : > { %4528 = vst [vmem:[%s6167_s30 + $0xe8] sm:$0xff] %v4492_v15   ;;  %v3454_v9 = vsel %vm1635_vm3, %v6446_v14, %v3390_v24 }
 0x26b   : > { %v3549_v22 = vmul.f32 0.2, %v3485_v36  ;;  %v3486_v17 = vadd.f32 %v6402_v1, %v3454_v9  ;;  %vm3517_vm6 = vcmp.gt.f32.partialorder %v3485_v36, 0.0 }
 0x26d   : > { %vm3518_vm7 = vcmp.gt.f32.partialorder %v3486_v17, 0.0  ;;  %v3550_v27 = vmul.f32 0.2, %v3486_v17  ;;  %v3581_v45 = vsel %vm3517_vm6, %v3485_v36, %v3549_v22 }
 0x26f   : > { %v3582_v63 = vsel %vm3518_vm7, %v3486_v17, %v3550_v27 }
 0x270   : > { %v4497_v40 = vpack.c.bf16 %v3582_v63, %v3581_v45 }
 0x272   : > { %4529 = vst [vmem:[%s6167_s30 + $0xf8] sm:$0xff] %v4497_v40  }
 0x273 PF: > { %s13_s12 = sadd.s32 1, %s5118_s12  }
 0x274   : > { %p10_p4 = scmp.ge.s32.totalorder %s13_s12, 4  }
 0x276   :  { %12 = sbr.rel (!%p10_p4) target bundleno = 1 (0x1), region = 67 }

</bundles_post_ra>
